<compile_context>
chip_gen: v7x
topology: tpu7x:2x2x1
jax: 0.10.0
libtpu: 0.0.40
codegen_flags: <defaults>
</compile_context>

<pallas_src>
import jax
import jax.numpy as jnp
from jax.experimental import pallas as pl
from jax.experimental.pallas import tpu as pltpu

NUM_CLASSES = 10
LRELU_SLOPE = 0.2


# -----------------------------------------------------------------------------
# Fused kernel: conv1 + conv2 (in-VMEM im2col via parity blocks) + both heads.
# Grid = (batch,); each grid step processes one full image in VMEM.
# -----------------------------------------------------------------------------
def _disc_fused_kernel(p1_ref, m1_ref, w1_ref, b1_ref, w2_ref, b2_ref,
                       wh_ref, bh_ref, heads_ref, feat_ref):
    # ---- conv1: Conv2d(1, 64, 4, 2, 1) + LeakyReLU(0.2) ---------------------
    # p1_ref[0]: [256,16] im2col patches for the PADDED 16x16 conv1-output grid,
    # rows ordered as parity blocks (pi, pj, i, j) so that conv2 can consume
    # contiguous 64-row slices without any in-kernel gather.
    p1 = p1_ref[0]                                                # [256,16] bf16
    h1 = jnp.dot(p1, w1_ref[...], preferred_element_type=jnp.float32)
    h1 = h1 + b1_ref[...]                                         # [256,64]
    h1 = jnp.where(h1 >= 0.0, h1, LRELU_SLOPE * h1)
    h1 = h1 * m1_ref[...]            # zero the padding ring of the 16x16 map
    h1 = h1.astype(jnp.bfloat16)     # padded h1 in parity-split layout

    # ---- conv2: Conv2d(64, 128, 4, 2, 1) + LeakyReLU(0.2) -------------------
    # stride-2 4x4 conv == 16 matmuls [64,64]@[64,128] accumulated into four
    # shift accumulators (one per (di,dj) kernel-offset half), then combined.
    accs = [[None, None], [None, None]]
    for di in range(2):
        for dj in range(2):
            acc = jnp.zeros((64, 128), jnp.float32)
            for pi in range(2):
                for pj in range(2):
                    ki = 2 * di + pi
                    kj = 2 * dj + pj
                    base = (pi * 2 + pj) * 64
                    lhs = h1[base:base + 64, :]                   # [64,64]
                    acc = acc + jnp.dot(lhs, w2_ref[ki * 4 + kj],
                                        preferred_element_type=jnp.float32)
            accs[di][dj] = acc.reshape(8, 8, 128)
    feat = (accs[0][0][0:7, 0:7] + accs[0][1][0:7, 1:8]
            + accs[1][0][1:8, 0:7] + accs[1][1][1:8, 1:8])        # [7,7,128]
    feat = feat + b2_ref[...]
    feat = jnp.where(feat >= 0.0, feat, LRELU_SLOPE * feat)
    feat_ref[0] = feat                                            # HWC feature map

    # ---- heads: adv (sigmoid) + cls, fused VPU multiply-reduce epilogue -----
    out = bh_ref[...]                                             # [1,16] f32
    lane = jax.lax.broadcasted_iota(jnp.int32, (1, 16), 1)
    for n in range(NUM_CLASSES + 1):                              # 0=adv, 1..10=cls
        wn = wh_ref[n].astype(jnp.float32)                        # [7,7,128]
        hv = jnp.sum(feat * wn)
        out = jnp.where(lane == n, out + hv, out)
    sig = 1.0 / (1.0 + jnp.exp(-out))
    out = jnp.where(lane == 0, sig, out)                          # sigmoid on adv only
    heads_ref[0] = out


# -----------------------------------------------------------------------------
# Wrapper-side glue (tiny XLA ops feeding the single pallas_call).
# -----------------------------------------------------------------------------
def _conv1_patches(x):
    """x: [B,28,28] f32 -> [B,256,16] bf16 conv1 im2col patches laid out for the
    kernel's parity-block ordering of the padded 16x16 conv1-output grid."""
    B = x.shape[0]
    xp = jnp.pad(x, ((0, 0), (1, 1), (1, 1)))                     # [B,30,30]
    cols = [xp[:, ki:ki + 27:2, kj:kj + 27:2]
            for ki in range(4) for kj in range(4)]
    p = jnp.stack(cols, axis=-1)                                  # [B,14,14,16]
    p = jnp.pad(p, ((0, 0), (1, 1), (1, 1), (0, 0)))              # [B,16,16,16]
    # (r,c) -> (i,pi,j,pj) with r=2i+pi, c=2j+pj; order rows as (pi,pj,i,j).
    p = p.reshape(B, 8, 2, 8, 2, 16).transpose(0, 2, 4, 1, 3, 5)
    return p.reshape(B, 256, 16).astype(jnp.bfloat16)


def _pad_mask():
    """[256,1] f32: 1.0 at valid conv1-output positions of the padded 16x16 grid
    (parity-block order), 0.0 on the padding ring (so LeakyReLU(bias) is zeroed)."""
    m = jnp.pad(jnp.ones((14, 14), jnp.float32), ((1, 1), (1, 1)))
    return m.reshape(8, 2, 8, 2).transpose(1, 3, 0, 2).reshape(256, 1)


def discriminator_forward(params, x):
    """x: NCHW [B,1,28,28] -> (adv [B,1], cls [B,10], feat_f [B,6272])."""
    B = x.shape[0]
    p1 = _conv1_patches(x.astype(jnp.float32).reshape(B, 28, 28))

    heads, feat = pl.pallas_call(
        _disc_fused_kernel,
        out_shape=(jax.ShapeDtypeStruct((B, 1, 16), jnp.float32),
                   jax.ShapeDtypeStruct((B, 7, 7, 128), jnp.float32)),
        grid_spec=pltpu.PrefetchScalarGridSpec(
            num_scalar_prefetch=0,
            grid=(B,),
            in_specs=[
                pl.BlockSpec((1, 256, 16), lambda b: (b, 0, 0)),          # patches
                pl.BlockSpec((256, 1), lambda b: (0, 0)),                 # pad mask
                pl.BlockSpec((16, 64), lambda b: (0, 0)),                 # w1
                pl.BlockSpec((1, 64), lambda b: (0, 0)),                  # b1
                pl.BlockSpec((16, 64, 128), lambda b: (0, 0, 0)),         # w2
                pl.BlockSpec((1, 128), lambda b: (0, 0)),                 # b2
                pl.BlockSpec((NUM_CLASSES + 1, 7, 7, 128),
                             lambda b: (0, 0, 0, 0)),                     # head weights
                pl.BlockSpec((1, 16), lambda b: (0, 0)),                  # head bias
            ],
            out_specs=[
                pl.BlockSpec((1, 1, 16), lambda b: (b, 0, 0)),            # adv+cls
                pl.BlockSpec((1, 7, 7, 128), lambda b: (b, 0, 0, 0)),     # feat (HWC)
            ],
        ),
        compiler_params=pltpu.CompilerParams(
            dimension_semantics=("parallel",)),
    )(p1, params["pad_mask"], params["w1"], params["b1"],
      params["w2"], params["b2"], params["wh"], params["bh"])

    adv = heads[:, 0, 0:1]
    cls = heads[:, 0, 1:1 + NUM_CLASSES]
    # TODO(synk): emit feat_f directly in CHW order from the kernel to drop this
    # small (~50 KB) XLA transpose; kept host-side for lowering robustness.
    feat_f = feat.transpose(0, 3, 1, 2).reshape(B, 128 * 7 * 7)
    return adv, cls, feat_f


# -----------------------------------------------------------------------------
# Deterministic synthetic parameters (shapes from the nn.Module __init__).
# Spectral norm applied once via converged power iteration (weight preprocessing).
# -----------------------------------------------------------------------------
def _spectral_normalize(w, n_iter=50, eps=1e-12):
    m = w.reshape(w.shape[0], -1).astype(jnp.float32)
    u = jnp.full((m.shape[0],), 1.0 / jnp.sqrt(m.shape[0]), jnp.float32)
    v = None
    for _ in range(n_iter):
        v = m.T @ u
        v = v / (jnp.linalg.norm(v) + eps)
        u = m @ v
        u = u / (jnp.linalg.norm(u) + eps)
    sigma = u @ (m @ v)
    return w / sigma


def init_params(key):
    ks = jax.random.split(key, 4)
    s = 0.02
    p = {}

    # Conv2d(1, 64, 4, 2, 1): PyTorch weight [64, 1, 4, 4] -> [16, 64]
    w1 = _spectral_normalize(jax.random.normal(ks[0], (64, 1, 4, 4), jnp.float32) * s)
    p["w1"] = jnp.transpose(w1, (2, 3, 1, 0)).reshape(16, 64).astype(jnp.bfloat16)
    p["b1"] = jnp.zeros((1, 64), jnp.float32)

    # Conv2d(64, 128, 4, 2, 1): PyTorch weight [128, 64, 4, 4] -> [16, 64, 128]
    w2 = _spectral_normalize(jax.random.normal(ks[1], (128, 64, 4, 4), jnp.float32) * s)
    p["w2"] = jnp.transpose(w2, (2, 3, 1, 0)).reshape(16, 64, 128).astype(jnp.bfloat16)
    p["b2"] = jnp.zeros((1, 128), jnp.float32)

    # Linear heads over CHW-flattened [B, 128*7*7] features; stored dense as
    # [11, 7, 7, 128] (n, h, w, c) to match the kernel's HWC feature block.
    in_dim = 128 * 7 * 7
    adv_w = _spectral_normalize(jax.random.normal(ks[2], (1, in_dim), jnp.float32) * s)
    cls_w = _spectral_normalize(
        jax.random.normal(ks[3], (NUM_CLASSES, in_dim), jnp.float32) * s)
    wh = jnp.concatenate([adv_w, cls_w], axis=0)                  # [11, 6272] (CHW)
    wh = wh.reshape(NUM_CLASSES + 1, 128, 7, 7).transpose(0, 2, 3, 1)
    p["wh"] = wh.astype(jnp.bfloat16)                             # [11,7,7,128]
    p["bh"] = jnp.zeros((1, 16), jnp.float32)                     # lane0=adv, 1..10=cls
    p["pad_mask"] = _pad_mask()
    return p


if __name__ == "__main__":
    key = jax.random.PRNGKey(0)
    kp, kx = jax.random.split(key)

    B = 2
    params = init_params(kp)
    x = jax.random.normal(kx, (B, 1, 28, 28), jnp.float32)

    fwd = jax.jit(discriminator_forward)
    adv, cls, feat_f = jax.block_until_ready(fwd(params, x))

    assert adv.shape == (B, 1), adv.shape
    assert cls.shape == (B, NUM_CLASSES), cls.shape
    assert feat_f.shape == (B, 128 * 7 * 7), feat_f.shape
    assert adv.dtype == jnp.float32 and cls.dtype == jnp.float32
    assert bool(jnp.all(jnp.isfinite(adv)))
    assert bool(jnp.all(jnp.isfinite(cls)))
    assert bool(jnp.all(jnp.isfinite(feat_f)))
    assert bool(jnp.all((adv > 0.0) & (adv < 1.0)))   # sigmoid output range
    print("KERNEL_OK")
</pallas_src>

<mosaic_0001>
module attributes {stable_mosaic.version = 11 : i64} {
  func.func @_disc_fused_kernel(%arg0: i32, %arg1: memref<1x256x16xbf16, #tpu.memory_space<vmem>>, %arg2: memref<256x1xf32, #tpu.memory_space<vmem>>, %arg3: memref<16x64xbf16, #tpu.memory_space<vmem>>, %arg4: memref<1x64xf32, #tpu.memory_space<vmem>>, %arg5: memref<16x64x128xbf16, #tpu.memory_space<vmem>>, %arg6: memref<1x128xf32, #tpu.memory_space<vmem>>, %arg7: memref<11x7x7x128xbf16, #tpu.memory_space<vmem>>, %arg8: memref<1x16xf32, #tpu.memory_space<vmem>>, %arg9: memref<1x1x16xf32, #tpu.memory_space<vmem>>, %arg10: memref<1x7x7x128xf32, #tpu.memory_space<vmem>>) attributes {dimension_semantics = [#tpu.dimension_semantics<parallel>], iteration_bounds = array<i64: 2>, scalar_prefetch = 0 : i64, scratch_operands = 0 : i64, tpu.core_type = #tpu.core_type<tc>, window_params = [{transform_indices = @transform_0, window_bounds = array<i64: 1, 256, 16>}, {pipeline_mode = #tpu.pipeline_mode<synchronous>, transform_indices = @transform_1, window_bounds = array<i64: 256, 1>}, {pipeline_mode = #tpu.pipeline_mode<synchronous>, transform_indices = @transform_2, window_bounds = array<i64: 16, 64>}, {pipeline_mode = #tpu.pipeline_mode<synchronous>, transform_indices = @transform_3, window_bounds = array<i64: 1, 64>}, {pipeline_mode = #tpu.pipeline_mode<synchronous>, transform_indices = @transform_4, window_bounds = array<i64: 16, 64, 128>}, {pipeline_mode = #tpu.pipeline_mode<synchronous>, transform_indices = @transform_5, window_bounds = array<i64: 1, 128>}, {pipeline_mode = #tpu.pipeline_mode<synchronous>, transform_indices = @transform_6, window_bounds = array<i64: 11, 7, 7, 128>}, {pipeline_mode = #tpu.pipeline_mode<synchronous>, transform_indices = @transform_7, window_bounds = array<i64: 1, 16>}, {transform_indices = @transform_8, window_bounds = array<i64: 1, 1, 16>}, {transform_indices = @transform_9, window_bounds = array<i64: 1, 7, 7, 128>}]} {
    %c0 = arith.constant 0 : index
    %c0_0 = arith.constant 0 : index
    %c0_1 = arith.constant 0 : index
    %0 = vector.load %arg1[%c0, %c0_0, %c0_1] : memref<1x256x16xbf16, #tpu.memory_space<vmem>>, vector<1x256x16xbf16>
    %1 = vector.shape_cast %0 : vector<1x256x16xbf16> to vector<256x16xbf16>
    %c0_2 = arith.constant 0 : index
    %c0_3 = arith.constant 0 : index
    %2 = vector.load %arg3[%c0_2, %c0_3] : memref<16x64xbf16, #tpu.memory_space<vmem>>, vector<16x64xbf16>
    %cst = arith.constant dense<0.000000e+00> : vector<256x64xf32>
    %3 = tpu.matmul %1, %2, %cst {dimension_numbers = #tpu.dot_dimension_numbers<[1], [0], [0], [1], [0, 0, 1, 1], [], []>} : vector<256x16xbf16>, vector<16x64xbf16>, vector<256x64xf32> -> vector<256x64xf32>
    %c0_4 = arith.constant 0 : index
    %c0_5 = arith.constant 0 : index
    %4 = vector.load %arg4[%c0_4, %c0_5] : memref<1x64xf32, #tpu.memory_space<vmem>>, vector<1x64xf32>
    %5 = vector.broadcast %4 : vector<1x64xf32> to vector<256x64xf32>
    %6 = arith.addf %3, %5 : vector<256x64xf32>
    %cst_6 = arith.constant 0.000000e+00 : f32
    %7 = vector.broadcast %cst_6 : f32 to vector<256x64xf32>
    %8 = arith.cmpf oge, %6, %7 : vector<256x64xf32>
    %cst_7 = arith.constant 2.000000e-01 : f32
    %9 = vector.broadcast %cst_7 : f32 to vector<256x64xf32>
    %10 = arith.mulf %9, %6 : vector<256x64xf32>
    %11 = arith.select %8, %6, %10 : vector<256x64xi1>, vector<256x64xf32>
    %c0_8 = arith.constant 0 : index
    %c0_9 = arith.constant 0 : index
    %12 = vector.load %arg2[%c0_8, %c0_9] : memref<256x1xf32, #tpu.memory_space<vmem>>, vector<256x1xf32>
    %13 = vector.broadcast %12 : vector<256x1xf32> to vector<256x64xf32>
    %14 = arith.mulf %11, %13 : vector<256x64xf32>
    %15 = arith.truncf %14 : vector<256x64xf32> to vector<256x64xbf16>
    %cst_10 = arith.constant 0.000000e+00 : f32
    %16 = vector.broadcast %cst_10 : f32 to vector<64x128xf32>
    %17 = vector.extract_strided_slice %15 {offsets = [0, 0], sizes = [64, 64], strides = [1, 1]} : vector<256x64xbf16> to vector<64x64xbf16>
    %c0_11 = arith.constant 0 : index
    %c0_12 = arith.constant 0 : index
    %c0_13 = arith.constant 0 : index
    %18 = vector.load %arg5[%c0_11, %c0_12, %c0_13] : memref<16x64x128xbf16, #tpu.memory_space<vmem>>, vector<1x64x128xbf16>
    %19 = vector.shape_cast %18 : vector<1x64x128xbf16> to vector<64x128xbf16>
    %cst_14 = arith.constant dense<0.000000e+00> : vector<64x128xf32>
    %20 = tpu.matmul %17, %19, %cst_14 {dimension_numbers = #tpu.dot_dimension_numbers<[1], [0], [0], [1], [0, 0, 1, 1], [], []>} : vector<64x64xbf16>, vector<64x128xbf16>, vector<64x128xf32> -> vector<64x128xf32>
    %21 = arith.addf %16, %20 : vector<64x128xf32>
    %22 = vector.extract_strided_slice %15 {offsets = [64, 0], sizes = [64, 64], strides = [1, 1]} : vector<256x64xbf16> to vector<64x64xbf16>
    %c1 = arith.constant 1 : index
    %c0_15 = arith.constant 0 : index
    %c0_16 = arith.constant 0 : index
    %23 = vector.load %arg5[%c1, %c0_15, %c0_16] : memref<16x64x128xbf16, #tpu.memory_space<vmem>>, vector<1x64x128xbf16>
    %24 = vector.shape_cast %23 : vector<1x64x128xbf16> to vector<64x128xbf16>
    %cst_17 = arith.constant dense<0.000000e+00> : vector<64x128xf32>
    %25 = tpu.matmul %22, %24, %cst_17 {dimension_numbers = #tpu.dot_dimension_numbers<[1], [0], [0], [1], [0, 0, 1, 1], [], []>} : vector<64x64xbf16>, vector<64x128xbf16>, vector<64x128xf32> -> vector<64x128xf32>
    %26 = arith.addf %21, %25 : vector<64x128xf32>
    %27 = vector.extract_strided_slice %15 {offsets = [128, 0], sizes = [64, 64], strides = [1, 1]} : vector<256x64xbf16> to vector<64x64xbf16>
    %c4 = arith.constant 4 : index
    %c0_18 = arith.constant 0 : index
    %c0_19 = arith.constant 0 : index
    %28 = vector.load %arg5[%c4, %c0_18, %c0_19] : memref<16x64x128xbf16, #tpu.memory_space<vmem>>, vector<1x64x128xbf16>
    %29 = vector.shape_cast %28 : vector<1x64x128xbf16> to vector<64x128xbf16>
    %cst_20 = arith.constant dense<0.000000e+00> : vector<64x128xf32>
    %30 = tpu.matmul %27, %29, %cst_20 {dimension_numbers = #tpu.dot_dimension_numbers<[1], [0], [0], [1], [0, 0, 1, 1], [], []>} : vector<64x64xbf16>, vector<64x128xbf16>, vector<64x128xf32> -> vector<64x128xf32>
    %31 = arith.addf %26, %30 : vector<64x128xf32>
    %32 = vector.extract_strided_slice %15 {offsets = [192, 0], sizes = [64, 64], strides = [1, 1]} : vector<256x64xbf16> to vector<64x64xbf16>
    %c5 = arith.constant 5 : index
    %c0_21 = arith.constant 0 : index
    %c0_22 = arith.constant 0 : index
    %33 = vector.load %arg5[%c5, %c0_21, %c0_22] : memref<16x64x128xbf16, #tpu.memory_space<vmem>>, vector<1x64x128xbf16>
    %34 = vector.shape_cast %33 : vector<1x64x128xbf16> to vector<64x128xbf16>
    %cst_23 = arith.constant dense<0.000000e+00> : vector<64x128xf32>
    %35 = tpu.matmul %32, %34, %cst_23 {dimension_numbers = #tpu.dot_dimension_numbers<[1], [0], [0], [1], [0, 0, 1, 1], [], []>} : vector<64x64xbf16>, vector<64x128xbf16>, vector<64x128xf32> -> vector<64x128xf32>
    %36 = arith.addf %31, %35 : vector<64x128xf32>
    %37 = vector.shape_cast %36 : vector<64x128xf32> to vector<8x8x128xf32>
    %cst_24 = arith.constant 0.000000e+00 : f32
    %38 = vector.broadcast %cst_24 : f32 to vector<64x128xf32>
    %39 = vector.extract_strided_slice %15 {offsets = [0, 0], sizes = [64, 64], strides = [1, 1]} : vector<256x64xbf16> to vector<64x64xbf16>
    %c2 = arith.constant 2 : index
    %c0_25 = arith.constant 0 : index
    %c0_26 = arith.constant 0 : index
    %40 = vector.load %arg5[%c2, %c0_25, %c0_26] : memref<16x64x128xbf16, #tpu.memory_space<vmem>>, vector<1x64x128xbf16>
    %41 = vector.shape_cast %40 : vector<1x64x128xbf16> to vector<64x128xbf16>
    %cst_27 = arith.constant dense<0.000000e+00> : vector<64x128xf32>
    %42 = tpu.matmul %39, %41, %cst_27 {dimension_numbers = #tpu.dot_dimension_numbers<[1], [0], [0], [1], [0, 0, 1, 1], [], []>} : vector<64x64xbf16>, vector<64x128xbf16>, vector<64x128xf32> -> vector<64x128xf32>
    %43 = arith.addf %38, %42 : vector<64x128xf32>
    %44 = vector.extract_strided_slice %15 {offsets = [64, 0], sizes = [64, 64], strides = [1, 1]} : vector<256x64xbf16> to vector<64x64xbf16>
    %c3 = arith.constant 3 : index
    %c0_28 = arith.constant 0 : index
    %c0_29 = arith.constant 0 : index
    %45 = vector.load %arg5[%c3, %c0_28, %c0_29] : memref<16x64x128xbf16, #tpu.memory_space<vmem>>, vector<1x64x128xbf16>
    %46 = vector.shape_cast %45 : vector<1x64x128xbf16> to vector<64x128xbf16>
    %cst_30 = arith.constant dense<0.000000e+00> : vector<64x128xf32>
    %47 = tpu.matmul %44, %46, %cst_30 {dimension_numbers = #tpu.dot_dimension_numbers<[1], [0], [0], [1], [0, 0, 1, 1], [], []>} : vector<64x64xbf16>, vector<64x128xbf16>, vector<64x128xf32> -> vector<64x128xf32>
    %48 = arith.addf %43, %47 : vector<64x128xf32>
    %49 = vector.extract_strided_slice %15 {offsets = [128, 0], sizes = [64, 64], strides = [1, 1]} : vector<256x64xbf16> to vector<64x64xbf16>
    %c6 = arith.constant 6 : index
    %c0_31 = arith.constant 0 : index
    %c0_32 = arith.constant 0 : index
    %50 = vector.load %arg5[%c6, %c0_31, %c0_32] : memref<16x64x128xbf16, #tpu.memory_space<vmem>>, vector<1x64x128xbf16>
    %51 = vector.shape_cast %50 : vector<1x64x128xbf16> to vector<64x128xbf16>
    %cst_33 = arith.constant dense<0.000000e+00> : vector<64x128xf32>
    %52 = tpu.matmul %49, %51, %cst_33 {dimension_numbers = #tpu.dot_dimension_numbers<[1], [0], [0], [1], [0, 0, 1, 1], [], []>} : vector<64x64xbf16>, vector<64x128xbf16>, vector<64x128xf32> -> vector<64x128xf32>
    %53 = arith.addf %48, %52 : vector<64x128xf32>
    %54 = vector.extract_strided_slice %15 {offsets = [192, 0], sizes = [64, 64], strides = [1, 1]} : vector<256x64xbf16> to vector<64x64xbf16>
    %c7 = arith.constant 7 : index
    %c0_34 = arith.constant 0 : index
    %c0_35 = arith.constant 0 : index
    %55 = vector.load %arg5[%c7, %c0_34, %c0_35] : memref<16x64x128xbf16, #tpu.memory_space<vmem>>, vector<1x64x128xbf16>
    %56 = vector.shape_cast %55 : vector<1x64x128xbf16> to vector<64x128xbf16>
    %cst_36 = arith.constant dense<0.000000e+00> : vector<64x128xf32>
    %57 = tpu.matmul %54, %56, %cst_36 {dimension_numbers = #tpu.dot_dimension_numbers<[1], [0], [0], [1], [0, 0, 1, 1], [], []>} : vector<64x64xbf16>, vector<64x128xbf16>, vector<64x128xf32> -> vector<64x128xf32>
    %58 = arith.addf %53, %57 : vector<64x128xf32>
    %59 = vector.shape_cast %58 : vector<64x128xf32> to vector<8x8x128xf32>
    %cst_37 = arith.constant 0.000000e+00 : f32
    %60 = vector.broadcast %cst_37 : f32 to vector<64x128xf32>
    %61 = vector.extract_strided_slice %15 {offsets = [0, 0], sizes = [64, 64], strides = [1, 1]} : vector<256x64xbf16> to vector<64x64xbf16>
    %c8 = arith.constant 8 : index
    %c0_38 = arith.constant 0 : index
    %c0_39 = arith.constant 0 : index
    %62 = vector.load %arg5[%c8, %c0_38, %c0_39] : memref<16x64x128xbf16, #tpu.memory_space<vmem>>, vector<1x64x128xbf16>
    %63 = vector.shape_cast %62 : vector<1x64x128xbf16> to vector<64x128xbf16>
    %cst_40 = arith.constant dense<0.000000e+00> : vector<64x128xf32>
    %64 = tpu.matmul %61, %63, %cst_40 {dimension_numbers = #tpu.dot_dimension_numbers<[1], [0], [0], [1], [0, 0, 1, 1], [], []>} : vector<64x64xbf16>, vector<64x128xbf16>, vector<64x128xf32> -> vector<64x128xf32>
    %65 = arith.addf %60, %64 : vector<64x128xf32>
    %66 = vector.extract_strided_slice %15 {offsets = [64, 0], sizes = [64, 64], strides = [1, 1]} : vector<256x64xbf16> to vector<64x64xbf16>
    %c9 = arith.constant 9 : index
    %c0_41 = arith.constant 0 : index
    %c0_42 = arith.constant 0 : index
    %67 = vector.load %arg5[%c9, %c0_41, %c0_42] : memref<16x64x128xbf16, #tpu.memory_space<vmem>>, vector<1x64x128xbf16>
    %68 = vector.shape_cast %67 : vector<1x64x128xbf16> to vector<64x128xbf16>
    %cst_43 = arith.constant dense<0.000000e+00> : vector<64x128xf32>
    %69 = tpu.matmul %66, %68, %cst_43 {dimension_numbers = #tpu.dot_dimension_numbers<[1], [0], [0], [1], [0, 0, 1, 1], [], []>} : vector<64x64xbf16>, vector<64x128xbf16>, vector<64x128xf32> -> vector<64x128xf32>
    %70 = arith.addf %65, %69 : vector<64x128xf32>
    %71 = vector.extract_strided_slice %15 {offsets = [128, 0], sizes = [64, 64], strides = [1, 1]} : vector<256x64xbf16> to vector<64x64xbf16>
    %c12 = arith.constant 12 : index
    %c0_44 = arith.constant 0 : index
    %c0_45 = arith.constant 0 : index
    %72 = vector.load %arg5[%c12, %c0_44, %c0_45] : memref<16x64x128xbf16, #tpu.memory_space<vmem>>, vector<1x64x128xbf16>
    %73 = vector.shape_cast %72 : vector<1x64x128xbf16> to vector<64x128xbf16>
    %cst_46 = arith.constant dense<0.000000e+00> : vector<64x128xf32>
    %74 = tpu.matmul %71, %73, %cst_46 {dimension_numbers = #tpu.dot_dimension_numbers<[1], [0], [0], [1], [0, 0, 1, 1], [], []>} : vector<64x64xbf16>, vector<64x128xbf16>, vector<64x128xf32> -> vector<64x128xf32>
    %75 = arith.addf %70, %74 : vector<64x128xf32>
    %76 = vector.extract_strided_slice %15 {offsets = [192, 0], sizes = [64, 64], strides = [1, 1]} : vector<256x64xbf16> to vector<64x64xbf16>
    %c13 = arith.constant 13 : index
    %c0_47 = arith.constant 0 : index
    %c0_48 = arith.constant 0 : index
    %77 = vector.load %arg5[%c13, %c0_47, %c0_48] : memref<16x64x128xbf16, #tpu.memory_space<vmem>>, vector<1x64x128xbf16>
    %78 = vector.shape_cast %77 : vector<1x64x128xbf16> to vector<64x128xbf16>
    %cst_49 = arith.constant dense<0.000000e+00> : vector<64x128xf32>
    %79 = tpu.matmul %76, %78, %cst_49 {dimension_numbers = #tpu.dot_dimension_numbers<[1], [0], [0], [1], [0, 0, 1, 1], [], []>} : vector<64x64xbf16>, vector<64x128xbf16>, vector<64x128xf32> -> vector<64x128xf32>
    %80 = arith.addf %75, %79 : vector<64x128xf32>
    %81 = vector.shape_cast %80 : vector<64x128xf32> to vector<8x8x128xf32>
    %cst_50 = arith.constant 0.000000e+00 : f32
    %82 = vector.broadcast %cst_50 : f32 to vector<64x128xf32>
    %83 = vector.extract_strided_slice %15 {offsets = [0, 0], sizes = [64, 64], strides = [1, 1]} : vector<256x64xbf16> to vector<64x64xbf16>
    %c10 = arith.constant 10 : index
    %c0_51 = arith.constant 0 : index
    %c0_52 = arith.constant 0 : index
    %84 = vector.load %arg5[%c10, %c0_51, %c0_52] : memref<16x64x128xbf16, #tpu.memory_space<vmem>>, vector<1x64x128xbf16>
    %85 = vector.shape_cast %84 : vector<1x64x128xbf16> to vector<64x128xbf16>
    %cst_53 = arith.constant dense<0.000000e+00> : vector<64x128xf32>
    %86 = tpu.matmul %83, %85, %cst_53 {dimension_numbers = #tpu.dot_dimension_numbers<[1], [0], [0], [1], [0, 0, 1, 1], [], []>} : vector<64x64xbf16>, vector<64x128xbf16>, vector<64x128xf32> -> vector<64x128xf32>
    %87 = arith.addf %82, %86 : vector<64x128xf32>
    %88 = vector.extract_strided_slice %15 {offsets = [64, 0], sizes = [64, 64], strides = [1, 1]} : vector<256x64xbf16> to vector<64x64xbf16>
    %c11 = arith.constant 11 : index
    %c0_54 = arith.constant 0 : index
    %c0_55 = arith.constant 0 : index
    %89 = vector.load %arg5[%c11, %c0_54, %c0_55] : memref<16x64x128xbf16, #tpu.memory_space<vmem>>, vector<1x64x128xbf16>
    %90 = vector.shape_cast %89 : vector<1x64x128xbf16> to vector<64x128xbf16>
    %cst_56 = arith.constant dense<0.000000e+00> : vector<64x128xf32>
    %91 = tpu.matmul %88, %90, %cst_56 {dimension_numbers = #tpu.dot_dimension_numbers<[1], [0], [0], [1], [0, 0, 1, 1], [], []>} : vector<64x64xbf16>, vector<64x128xbf16>, vector<64x128xf32> -> vector<64x128xf32>
    %92 = arith.addf %87, %91 : vector<64x128xf32>
    %93 = vector.extract_strided_slice %15 {offsets = [128, 0], sizes = [64, 64], strides = [1, 1]} : vector<256x64xbf16> to vector<64x64xbf16>
    %c14 = arith.constant 14 : index
    %c0_57 = arith.constant 0 : index
    %c0_58 = arith.constant 0 : index
    %94 = vector.load %arg5[%c14, %c0_57, %c0_58] : memref<16x64x128xbf16, #tpu.memory_space<vmem>>, vector<1x64x128xbf16>
    %95 = vector.shape_cast %94 : vector<1x64x128xbf16> to vector<64x128xbf16>
    %cst_59 = arith.constant dense<0.000000e+00> : vector<64x128xf32>
    %96 = tpu.matmul %93, %95, %cst_59 {dimension_numbers = #tpu.dot_dimension_numbers<[1], [0], [0], [1], [0, 0, 1, 1], [], []>} : vector<64x64xbf16>, vector<64x128xbf16>, vector<64x128xf32> -> vector<64x128xf32>
    %97 = arith.addf %92, %96 : vector<64x128xf32>
    %98 = vector.extract_strided_slice %15 {offsets = [192, 0], sizes = [64, 64], strides = [1, 1]} : vector<256x64xbf16> to vector<64x64xbf16>
    %c15 = arith.constant 15 : index
    %c0_60 = arith.constant 0 : index
    %c0_61 = arith.constant 0 : index
    %99 = vector.load %arg5[%c15, %c0_60, %c0_61] : memref<16x64x128xbf16, #tpu.memory_space<vmem>>, vector<1x64x128xbf16>
    %100 = vector.shape_cast %99 : vector<1x64x128xbf16> to vector<64x128xbf16>
    %cst_62 = arith.constant dense<0.000000e+00> : vector<64x128xf32>
    %101 = tpu.matmul %98, %100, %cst_62 {dimension_numbers = #tpu.dot_dimension_numbers<[1], [0], [0], [1], [0, 0, 1, 1], [], []>} : vector<64x64xbf16>, vector<64x128xbf16>, vector<64x128xf32> -> vector<64x128xf32>
    %102 = arith.addf %97, %101 : vector<64x128xf32>
    %103 = vector.shape_cast %102 : vector<64x128xf32> to vector<8x8x128xf32>
    %104 = vector.extract_strided_slice %37 {offsets = [0, 0, 0], sizes = [7, 7, 128], strides = [1, 1, 1]} : vector<8x8x128xf32> to vector<7x7x128xf32>
    %105 = vector.extract_strided_slice %59 {offsets = [0, 1, 0], sizes = [7, 7, 128], strides = [1, 1, 1]} : vector<8x8x128xf32> to vector<7x7x128xf32>
    %106 = arith.addf %104, %105 : vector<7x7x128xf32>
    %107 = vector.extract_strided_slice %81 {offsets = [1, 0, 0], sizes = [7, 7, 128], strides = [1, 1, 1]} : vector<8x8x128xf32> to vector<7x7x128xf32>
    %108 = arith.addf %106, %107 : vector<7x7x128xf32>
    %109 = vector.extract_strided_slice %103 {offsets = [1, 1, 0], sizes = [7, 7, 128], strides = [1, 1, 1]} : vector<8x8x128xf32> to vector<7x7x128xf32>
    %110 = arith.addf %108, %109 : vector<7x7x128xf32>
    %c0_63 = arith.constant 0 : index
    %c0_64 = arith.constant 0 : index
    %111 = vector.load %arg6[%c0_63, %c0_64] : memref<1x128xf32, #tpu.memory_space<vmem>>, vector<1x128xf32>
    %112 = vector.shape_cast %111 : vector<1x128xf32> to vector<1x1x128xf32>
    %113 = vector.broadcast %112 : vector<1x1x128xf32> to vector<7x7x128xf32>
    %114 = arith.addf %110, %113 : vector<7x7x128xf32>
    %cst_65 = arith.constant 0.000000e+00 : f32
    %115 = vector.broadcast %cst_65 : f32 to vector<7x7x128xf32>
    %116 = arith.cmpf oge, %114, %115 : vector<7x7x128xf32>
    %cst_66 = arith.constant 2.000000e-01 : f32
    %117 = vector.broadcast %cst_66 : f32 to vector<7x7x128xf32>
    %118 = arith.mulf %117, %114 : vector<7x7x128xf32>
    %119 = arith.select %116, %114, %118 : vector<7x7x128xi1>, vector<7x7x128xf32>
    %c0_67 = arith.constant 0 : index
    %c0_68 = arith.constant 0 : index
    %c0_69 = arith.constant 0 : index
    %c0_70 = arith.constant 0 : index
    %120 = vector.load %arg10[%c0_67, %c0_68, %c0_69, %c0_70] : memref<1x7x7x128xf32, #tpu.memory_space<vmem>>, vector<1x7x7x128xf32>
    %121 = vector.shape_cast %120 : vector<1x7x7x128xf32> to vector<7x7x128xf32>
    %122 = vector.shape_cast %119 : vector<7x7x128xf32> to vector<1x7x7x128xf32>
    tpu.vector_store %arg10[%c0_67, %c0_68, %c0_69, %c0_70], %122 {strides = array<i32>} : memref<1x7x7x128xf32, #tpu.memory_space<vmem>>, vector<1x7x7x128xf32>,
    %c0_71 = arith.constant 0 : index
    %c0_72 = arith.constant 0 : index
    %123 = vector.load %arg8[%c0_71, %c0_72] : memref<1x16xf32, #tpu.memory_space<vmem>>, vector<1x16xf32>
    %124 = tpu.iota {dimensions = array<i32: 1>} : vector<1x16xi32>
    %c0_73 = arith.constant 0 : index
    %c0_74 = arith.constant 0 : index
    %c0_75 = arith.constant 0 : index
    %c0_76 = arith.constant 0 : index
    %125 = vector.load %arg7[%c0_73, %c0_74, %c0_75, %c0_76] : memref<11x7x7x128xbf16, #tpu.memory_space<vmem>>, vector<1x7x7x128xbf16>
    %126 = vector.shape_cast %125 : vector<1x7x7x128xbf16> to vector<7x7x128xbf16>
    %127 = arith.extf %126 : vector<7x7x128xbf16> to vector<7x7x128xf32>
    %128 = arith.mulf %119, %127 : vector<7x7x128xf32>
    %129 = vector.shape_cast %128 : vector<7x7x128xf32> to vector<1x7x7x128xf32>
    %cst_77 = arith.constant dense<0.000000e+00> : vector<1xf32>
    %130 = vector.multi_reduction <add>, %129, %cst_77 [1, 2, 3] : vector<1x7x7x128xf32> to vector<1xf32>
    %131 = vector.shape_cast %130 : vector<1xf32> to vector<1x1x1x1xf32>
    %132 = vector.extract %131[0, 0, 0, 0] : f32 from vector<1x1x1x1xf32>
    %c0_i32 = arith.constant 0 : i32
    %133 = vector.broadcast %c0_i32 : i32 to vector<1x16xi32>
    %134 = arith.cmpi eq, %124, %133 : vector<1x16xi32>
    %135 = vector.broadcast %132 : f32 to vector<1x16xf32>
    %136 = arith.addf %123, %135 : vector<1x16xf32>
    %137 = arith.select %134, %136, %123 : vector<1x16xi1>, vector<1x16xf32>
    %c1_78 = arith.constant 1 : index
    %c0_79 = arith.constant 0 : index
    %c0_80 = arith.constant 0 : index
    %c0_81 = arith.constant 0 : index
    %138 = vector.load %arg7[%c1_78, %c0_79, %c0_80, %c0_81] : memref<11x7x7x128xbf16, #tpu.memory_space<vmem>>, vector<1x7x7x128xbf16>
    %139 = vector.shape_cast %138 : vector<1x7x7x128xbf16> to vector<7x7x128xbf16>
    %140 = arith.extf %139 : vector<7x7x128xbf16> to vector<7x7x128xf32>
    %141 = arith.mulf %119, %140 : vector<7x7x128xf32>
    %142 = vector.shape_cast %141 : vector<7x7x128xf32> to vector<1x7x7x128xf32>
    %cst_82 = arith.constant dense<0.000000e+00> : vector<1xf32>
    %143 = vector.multi_reduction <add>, %142, %cst_82 [1, 2, 3] : vector<1x7x7x128xf32> to vector<1xf32>
    %144 = vector.shape_cast %143 : vector<1xf32> to vector<1x1x1x1xf32>
    %145 = vector.extract %144[0, 0, 0, 0] : f32 from vector<1x1x1x1xf32>
    %c1_i32 = arith.constant 1 : i32
    %146 = vector.broadcast %c1_i32 : i32 to vector<1x16xi32>
    %147 = arith.cmpi eq, %124, %146 : vector<1x16xi32>
    %148 = vector.broadcast %145 : f32 to vector<1x16xf32>
    %149 = arith.addf %137, %148 : vector<1x16xf32>
    %150 = arith.select %147, %149, %137 : vector<1x16xi1>, vector<1x16xf32>
    %c2_83 = arith.constant 2 : index
    %c0_84 = arith.constant 0 : index
    %c0_85 = arith.constant 0 : index
    %c0_86 = arith.constant 0 : index
    %151 = vector.load %arg7[%c2_83, %c0_84, %c0_85, %c0_86] : memref<11x7x7x128xbf16, #tpu.memory_space<vmem>>, vector<1x7x7x128xbf16>
    %152 = vector.shape_cast %151 : vector<1x7x7x128xbf16> to vector<7x7x128xbf16>
    %153 = arith.extf %152 : vector<7x7x128xbf16> to vector<7x7x128xf32>
    %154 = arith.mulf %119, %153 : vector<7x7x128xf32>
    %155 = vector.shape_cast %154 : vector<7x7x128xf32> to vector<1x7x7x128xf32>
    %cst_87 = arith.constant dense<0.000000e+00> : vector<1xf32>
    %156 = vector.multi_reduction <add>, %155, %cst_87 [1, 2, 3] : vector<1x7x7x128xf32> to vector<1xf32>
    %157 = vector.shape_cast %156 : vector<1xf32> to vector<1x1x1x1xf32>
    %158 = vector.extract %157[0, 0, 0, 0] : f32 from vector<1x1x1x1xf32>
    %c2_i32 = arith.constant 2 : i32
    %159 = vector.broadcast %c2_i32 : i32 to vector<1x16xi32>
    %160 = arith.cmpi eq, %124, %159 : vector<1x16xi32>
    %161 = vector.broadcast %158 : f32 to vector<1x16xf32>
    %162 = arith.addf %150, %161 : vector<1x16xf32>
    %163 = arith.select %160, %162, %150 : vector<1x16xi1>, vector<1x16xf32>
    %c3_88 = arith.constant 3 : index
    %c0_89 = arith.constant 0 : index
    %c0_90 = arith.constant 0 : index
    %c0_91 = arith.constant 0 : index
    %164 = vector.load %arg7[%c3_88, %c0_89, %c0_90, %c0_91] : memref<11x7x7x128xbf16, #tpu.memory_space<vmem>>, vector<1x7x7x128xbf16>
    %165 = vector.shape_cast %164 : vector<1x7x7x128xbf16> to vector<7x7x128xbf16>
    %166 = arith.extf %165 : vector<7x7x128xbf16> to vector<7x7x128xf32>
    %167 = arith.mulf %119, %166 : vector<7x7x128xf32>
    %168 = vector.shape_cast %167 : vector<7x7x128xf32> to vector<1x7x7x128xf32>
    %cst_92 = arith.constant dense<0.000000e+00> : vector<1xf32>
    %169 = vector.multi_reduction <add>, %168, %cst_92 [1, 2, 3] : vector<1x7x7x128xf32> to vector<1xf32>
    %170 = vector.shape_cast %169 : vector<1xf32> to vector<1x1x1x1xf32>
    %171 = vector.extract %170[0, 0, 0, 0] : f32 from vector<1x1x1x1xf32>
    %c3_i32 = arith.constant 3 : i32
    %172 = vector.broadcast %c3_i32 : i32 to vector<1x16xi32>
    %173 = arith.cmpi eq, %124, %172 : vector<1x16xi32>
    %174 = vector.broadcast %171 : f32 to vector<1x16xf32>
    %175 = arith.addf %163, %174 : vector<1x16xf32>
    %176 = arith.select %173, %175, %163 : vector<1x16xi1>, vector<1x16xf32>
    %c4_93 = arith.constant 4 : index
    %c0_94 = arith.constant 0 : index
    %c0_95 = arith.constant 0 : index
    %c0_96 = arith.constant 0 : index
    %177 = vector.load %arg7[%c4_93, %c0_94, %c0_95, %c0_96] : memref<11x7x7x128xbf16, #tpu.memory_space<vmem>>, vector<1x7x7x128xbf16>
    %178 = vector.shape_cast %177 : vector<1x7x7x128xbf16> to vector<7x7x128xbf16>
    %179 = arith.extf %178 : vector<7x7x128xbf16> to vector<7x7x128xf32>
    %180 = arith.mulf %119, %179 : vector<7x7x128xf32>
    %181 = vector.shape_cast %180 : vector<7x7x128xf32> to vector<1x7x7x128xf32>
    %cst_97 = arith.constant dense<0.000000e+00> : vector<1xf32>
    %182 = vector.multi_reduction <add>, %181, %cst_97 [1, 2, 3] : vector<1x7x7x128xf32> to vector<1xf32>
    %183 = vector.shape_cast %182 : vector<1xf32> to vector<1x1x1x1xf32>
    %184 = vector.extract %183[0, 0, 0, 0] : f32 from vector<1x1x1x1xf32>
    %c4_i32 = arith.constant 4 : i32
    %185 = vector.broadcast %c4_i32 : i32 to vector<1x16xi32>
    %186 = arith.cmpi eq, %124, %185 : vector<1x16xi32>
    %187 = vector.broadcast %184 : f32 to vector<1x16xf32>
    %188 = arith.addf %176, %187 : vector<1x16xf32>
    %189 = arith.select %186, %188, %176 : vector<1x16xi1>, vector<1x16xf32>
    %c5_98 = arith.constant 5 : index
    %c0_99 = arith.constant 0 : index
    %c0_100 = arith.constant 0 : index
    %c0_101 = arith.constant 0 : index
    %190 = vector.load %arg7[%c5_98, %c0_99, %c0_100, %c0_101] : memref<11x7x7x128xbf16, #tpu.memory_space<vmem>>, vector<1x7x7x128xbf16>
    %191 = vector.shape_cast %190 : vector<1x7x7x128xbf16> to vector<7x7x128xbf16>
    %192 = arith.extf %191 : vector<7x7x128xbf16> to vector<7x7x128xf32>
    %193 = arith.mulf %119, %192 : vector<7x7x128xf32>
    %194 = vector.shape_cast %193 : vector<7x7x128xf32> to vector<1x7x7x128xf32>
    %cst_102 = arith.constant dense<0.000000e+00> : vector<1xf32>
    %195 = vector.multi_reduction <add>, %194, %cst_102 [1, 2, 3] : vector<1x7x7x128xf32> to vector<1xf32>
    %196 = vector.shape_cast %195 : vector<1xf32> to vector<1x1x1x1xf32>
    %197 = vector.extract %196[0, 0, 0, 0] : f32 from vector<1x1x1x1xf32>
    %c5_i32 = arith.constant 5 : i32
    %198 = vector.broadcast %c5_i32 : i32 to vector<1x16xi32>
    %199 = arith.cmpi eq, %124, %198 : vector<1x16xi32>
    %200 = vector.broadcast %197 : f32 to vector<1x16xf32>
    %201 = arith.addf %189, %200 : vector<1x16xf32>
    %202 = arith.select %199, %201, %189 : vector<1x16xi1>, vector<1x16xf32>
    %c6_103 = arith.constant 6 : index
    %c0_104 = arith.constant 0 : index
    %c0_105 = arith.constant 0 : index
    %c0_106 = arith.constant 0 : index
    %203 = vector.load %arg7[%c6_103, %c0_104, %c0_105, %c0_106] : memref<11x7x7x128xbf16, #tpu.memory_space<vmem>>, vector<1x7x7x128xbf16>
    %204 = vector.shape_cast %203 : vector<1x7x7x128xbf16> to vector<7x7x128xbf16>
    %205 = arith.extf %204 : vector<7x7x128xbf16> to vector<7x7x128xf32>
    %206 = arith.mulf %119, %205 : vector<7x7x128xf32>
    %207 = vector.shape_cast %206 : vector<7x7x128xf32> to vector<1x7x7x128xf32>
    %cst_107 = arith.constant dense<0.000000e+00> : vector<1xf32>
    %208 = vector.multi_reduction <add>, %207, %cst_107 [1, 2, 3] : vector<1x7x7x128xf32> to vector<1xf32>
    %209 = vector.shape_cast %208 : vector<1xf32> to vector<1x1x1x1xf32>
    %210 = vector.extract %209[0, 0, 0, 0] : f32 from vector<1x1x1x1xf32>
    %c6_i32 = arith.constant 6 : i32
    %211 = vector.broadcast %c6_i32 : i32 to vector<1x16xi32>
    %212 = arith.cmpi eq, %124, %211 : vector<1x16xi32>
    %213 = vector.broadcast %210 : f32 to vector<1x16xf32>
    %214 = arith.addf %202, %213 : vector<1x16xf32>
    %215 = arith.select %212, %214, %202 : vector<1x16xi1>, vector<1x16xf32>
    %c7_108 = arith.constant 7 : index
    %c0_109 = arith.constant 0 : index
    %c0_110 = arith.constant 0 : index
    %c0_111 = arith.constant 0 : index
    %216 = vector.load %arg7[%c7_108, %c0_109, %c0_110, %c0_111] : memref<11x7x7x128xbf16, #tpu.memory_space<vmem>>, vector<1x7x7x128xbf16>
    %217 = vector.shape_cast %216 : vector<1x7x7x128xbf16> to vector<7x7x128xbf16>
    %218 = arith.extf %217 : vector<7x7x128xbf16> to vector<7x7x128xf32>
    %219 = arith.mulf %119, %218 : vector<7x7x128xf32>
    %220 = vector.shape_cast %219 : vector<7x7x128xf32> to vector<1x7x7x128xf32>
    %cst_112 = arith.constant dense<0.000000e+00> : vector<1xf32>
    %221 = vector.multi_reduction <add>, %220, %cst_112 [1, 2, 3] : vector<1x7x7x128xf32> to vector<1xf32>
    %222 = vector.shape_cast %221 : vector<1xf32> to vector<1x1x1x1xf32>
    %223 = vector.extract %222[0, 0, 0, 0] : f32 from vector<1x1x1x1xf32>
    %c7_i32 = arith.constant 7 : i32
    %224 = vector.broadcast %c7_i32 : i32 to vector<1x16xi32>
    %225 = arith.cmpi eq, %124, %224 : vector<1x16xi32>
    %226 = vector.broadcast %223 : f32 to vector<1x16xf32>
    %227 = arith.addf %215, %226 : vector<1x16xf32>
    %228 = arith.select %225, %227, %215 : vector<1x16xi1>, vector<1x16xf32>
    %c8_113 = arith.constant 8 : index
    %c0_114 = arith.constant 0 : index
    %c0_115 = arith.constant 0 : index
    %c0_116 = arith.constant 0 : index
    %229 = vector.load %arg7[%c8_113, %c0_114, %c0_115, %c0_116] : memref<11x7x7x128xbf16, #tpu.memory_space<vmem>>, vector<1x7x7x128xbf16>
    %230 = vector.shape_cast %229 : vector<1x7x7x128xbf16> to vector<7x7x128xbf16>
    %231 = arith.extf %230 : vector<7x7x128xbf16> to vector<7x7x128xf32>
    %232 = arith.mulf %119, %231 : vector<7x7x128xf32>
    %233 = vector.shape_cast %232 : vector<7x7x128xf32> to vector<1x7x7x128xf32>
    %cst_117 = arith.constant dense<0.000000e+00> : vector<1xf32>
    %234 = vector.multi_reduction <add>, %233, %cst_117 [1, 2, 3] : vector<1x7x7x128xf32> to vector<1xf32>
    %235 = vector.shape_cast %234 : vector<1xf32> to vector<1x1x1x1xf32>
    %236 = vector.extract %235[0, 0, 0, 0] : f32 from vector<1x1x1x1xf32>
    %c8_i32 = arith.constant 8 : i32
    %237 = vector.broadcast %c8_i32 : i32 to vector<1x16xi32>
    %238 = arith.cmpi eq, %124, %237 : vector<1x16xi32>
    %239 = vector.broadcast %236 : f32 to vector<1x16xf32>
    %240 = arith.addf %228, %239 : vector<1x16xf32>
    %241 = arith.select %238, %240, %228 : vector<1x16xi1>, vector<1x16xf32>
    %c9_118 = arith.constant 9 : index
    %c0_119 = arith.constant 0 : index
    %c0_120 = arith.constant 0 : index
    %c0_121 = arith.constant 0 : index
    %242 = vector.load %arg7[%c9_118, %c0_119, %c0_120, %c0_121] : memref<11x7x7x128xbf16, #tpu.memory_space<vmem>>, vector<1x7x7x128xbf16>
    %243 = vector.shape_cast %242 : vector<1x7x7x128xbf16> to vector<7x7x128xbf16>
    %244 = arith.extf %243 : vector<7x7x128xbf16> to vector<7x7x128xf32>
    %245 = arith.mulf %119, %244 : vector<7x7x128xf32>
    %246 = vector.shape_cast %245 : vector<7x7x128xf32> to vector<1x7x7x128xf32>
    %cst_122 = arith.constant dense<0.000000e+00> : vector<1xf32>
    %247 = vector.multi_reduction <add>, %246, %cst_122 [1, 2, 3] : vector<1x7x7x128xf32> to vector<1xf32>
    %248 = vector.shape_cast %247 : vector<1xf32> to vector<1x1x1x1xf32>
    %249 = vector.extract %248[0, 0, 0, 0] : f32 from vector<1x1x1x1xf32>
    %c9_i32 = arith.constant 9 : i32
    %250 = vector.broadcast %c9_i32 : i32 to vector<1x16xi32>
    %251 = arith.cmpi eq, %124, %250 : vector<1x16xi32>
    %252 = vector.broadcast %249 : f32 to vector<1x16xf32>
    %253 = arith.addf %241, %252 : vector<1x16xf32>
    %254 = arith.select %251, %253, %241 : vector<1x16xi1>, vector<1x16xf32>
    %c10_123 = arith.constant 10 : index
    %c0_124 = arith.constant 0 : index
    %c0_125 = arith.constant 0 : index
    %c0_126 = arith.constant 0 : index
    %255 = vector.load %arg7[%c10_123, %c0_124, %c0_125, %c0_126] : memref<11x7x7x128xbf16, #tpu.memory_space<vmem>>, vector<1x7x7x128xbf16>
    %256 = vector.shape_cast %255 : vector<1x7x7x128xbf16> to vector<7x7x128xbf16>
    %257 = arith.extf %256 : vector<7x7x128xbf16> to vector<7x7x128xf32>
    %258 = arith.mulf %119, %257 : vector<7x7x128xf32>
    %259 = vector.shape_cast %258 : vector<7x7x128xf32> to vector<1x7x7x128xf32>
    %cst_127 = arith.constant dense<0.000000e+00> : vector<1xf32>
    %260 = vector.multi_reduction <add>, %259, %cst_127 [1, 2, 3] : vector<1x7x7x128xf32> to vector<1xf32>
    %261 = vector.shape_cast %260 : vector<1xf32> to vector<1x1x1x1xf32>
    %262 = vector.extract %261[0, 0, 0, 0] : f32 from vector<1x1x1x1xf32>
    %c10_i32 = arith.constant 10 : i32
    %263 = vector.broadcast %c10_i32 : i32 to vector<1x16xi32>
    %264 = arith.cmpi eq, %124, %263 : vector<1x16xi32>
    %265 = vector.broadcast %262 : f32 to vector<1x16xf32>
    %266 = arith.addf %254, %265 : vector<1x16xf32>
    %267 = arith.select %264, %266, %254 : vector<1x16xi1>, vector<1x16xf32>
    %cst_128 = arith.constant 0.000000e+00 : f32
    %268 = vector.broadcast %cst_128 : f32 to vector<1x16xf32>
    %269 = arith.subf %268, %267 : vector<1x16xf32>
    %270 = math.exp %269 : vector<1x16xf32>
    %cst_129 = arith.constant 1.000000e+00 : f32
    %271 = vector.broadcast %cst_129 : f32 to vector<1x16xf32>
    %272 = arith.addf %271, %270 : vector<1x16xf32>
    %cst_130 = arith.constant 1.000000e+00 : f32
    %273 = vector.broadcast %cst_130 : f32 to vector<1x16xf32>
    %274 = arith.divf %273, %272 : vector<1x16xf32>
    %c0_i32_131 = arith.constant 0 : i32
    %275 = vector.broadcast %c0_i32_131 : i32 to vector<1x16xi32>
    %276 = arith.cmpi eq, %124, %275 : vector<1x16xi32>
    %277 = arith.select %276, %274, %267 : vector<1x16xi1>, vector<1x16xf32>
    %c0_132 = arith.constant 0 : index
    %c0_133 = arith.constant 0 : index
    %c0_134 = arith.constant 0 : index
    %278 = vector.load %arg9[%c0_132, %c0_133, %c0_134] : memref<1x1x16xf32, #tpu.memory_space<vmem>>, vector<1x1x16xf32>
    %279 = vector.shape_cast %278 : vector<1x1x16xf32> to vector<1x16xf32>
    %280 = vector.shape_cast %277 : vector<1x16xf32> to vector<1x1x16xf32>
    tpu.vector_store %arg9[%c0_132, %c0_133, %c0_134], %280 {strides = array<i32>} : memref<1x1x16xf32, #tpu.memory_space<vmem>>, vector<1x1x16xf32>,
    return
  }
  func.func @transform_0(%arg0: i32) -> (i32, i32, i32) {
    %c0_i32 = arith.constant 0 : i32
    %c0_i32_0 = arith.constant 0 : i32
    %c0_i32_1 = arith.constant 0 : i32
    return %arg0, %c0_i32, %c0_i32_0 : i32, i32, i32
  }
  func.func @transform_1(%arg0: i32) -> (i32, i32) {
    %c0_i32 = arith.constant 0 : i32
    %c0_i32_0 = arith.constant 0 : i32
    %c0_i32_1 = arith.constant 0 : i32
    return %c0_i32, %c0_i32_0 : i32, i32
  }
  func.func @transform_2(%arg0: i32) -> (i32, i32) {
    %c0_i32 = arith.constant 0 : i32
    %c0_i32_0 = arith.constant 0 : i32
    %c0_i32_1 = arith.constant 0 : i32
    return %c0_i32, %c0_i32_0 : i32, i32
  }
  func.func @transform_3(%arg0: i32) -> (i32, i32) {
    %c0_i32 = arith.constant 0 : i32
    %c0_i32_0 = arith.constant 0 : i32
    %c0_i32_1 = arith.constant 0 : i32
    return %c0_i32, %c0_i32_0 : i32, i32
  }
  func.func @transform_4(%arg0: i32) -> (i32, i32, i32) {
    %c0_i32 = arith.constant 0 : i32
    %c0_i32_0 = arith.constant 0 : i32
    %c0_i32_1 = arith.constant 0 : i32
    %c0_i32_2 = arith.constant 0 : i32
    return %c0_i32, %c0_i32_0, %c0_i32_1 : i32, i32, i32
  }
  func.func @transform_5(%arg0: i32) -> (i32, i32) {
    %c0_i32 = arith.constant 0 : i32
    %c0_i32_0 = arith.constant 0 : i32
    %c0_i32_1 = arith.constant 0 : i32
    return %c0_i32, %c0_i32_0 : i32, i32
  }
  func.func @transform_6(%arg0: i32) -> (i32, i32, i32, i32) {
    %c0_i32 = arith.constant 0 : i32
    %c0_i32_0 = arith.constant 0 : i32
    %c0_i32_1 = arith.constant 0 : i32
    %c0_i32_2 = arith.constant 0 : i32
    %c0_i32_3 = arith.constant 0 : i32
    return %c0_i32, %c0_i32_0, %c0_i32_1, %c0_i32_2 : i32, i32, i32, i32
  }
  func.func @transform_7(%arg0: i32) -> (i32, i32) {
    %c0_i32 = arith.constant 0 : i32
    %c0_i32_0 = arith.constant 0 : i32
    %c0_i32_1 = arith.constant 0 : i32
    return %c0_i32, %c0_i32_0 : i32, i32
  }
  func.func @transform_8(%arg0: i32) -> (i32, i32, i32) {
    %c0_i32 = arith.constant 0 : i32
    %c0_i32_0 = arith.constant 0 : i32
    %c0_i32_1 = arith.constant 0 : i32
    return %arg0, %c0_i32, %c0_i32_0 : i32, i32, i32
  }
  func.func @transform_9(%arg0: i32) -> (i32, i32, i32, i32) {
    %c0_i32 = arith.constant 0 : i32
    %c0_i32_0 = arith.constant 0 : i32
    %c0_i32_1 = arith.constant 0 : i32
    %c0_i32_2 = arith.constant 0 : i32
    return %arg0, %c0_i32, %c0_i32_0, %c0_i32_1 : i32, i32, i32, i32
  }
}

</mosaic_0001>

<bundles_post_ra>
// kernel: discriminator_forward.1
= control target key start
LH: loop header
LB: loop body
LE: loop exit
PB: predicated region body
PF: predicated region fallthrough
CT: control target
= control target key end

     0   :  { %s4624_s30 = smov 0   ;;  %s5938_s0 = inlined_call_operand.vmem [shape: bf16[2,256,16], index: 0, kind: input, shape index: {}]   ;;  %s5939_s1 = inlined_call_operand.vmem [shape: f32[256,1], index: 1, kind: input, shape index: {}]   ;;  %s5940_s2 = inlined_call_operand.vmem [shape: bf16[16,64], index: 2, kind: input, shape index: {}]   ;;  %s5941_s3 = inlined_call_operand.vmem [shape: f32[1,64], index: 3, kind: input, shape index: {}]   ;;  %s5942_s4 = inlined_call_operand.vmem [shape: bf16[16,64,128], index: 4, kind: input, shape index: {}]   ;;  %s5943_s5 = inlined_call_operand.vmem [shape: f32[1,128], index: 5, kind: input, shape index: {}]   ;;  %s5944_s6 = inlined_call_operand.vmem [shape: bf16[11,7,7,128], index: 6, kind: input, shape index: {}]   ;;  %s5945_s7 = inlined_call_operand.vmem [shape: f32[1,16], index: 7, kind: input, shape index: {}]   ;;  %s5946_s8 = inlined_call_operand.vmem [shape: f32[2,1,16], index: 8, kind: output, shape index: {0}]   ;;  %s5947_s9 = inlined_call_operand.vmem [shape: f32[2,7,7,128], index: 9, kind: output, shape index: {1}]  }
   0x1 LB: > { %s3397_s10 = sadd.s32 4294967295, %s4571_s30   ;;  %p3401_p0 = scmp.ge.s32.totalorder %s4571_s30, 1  ;;  %s4571_s30 = sphi %s4624_s30, %s20_s30  }
   0x2   : > { %p290_p1 = scmp.lt.s32.totalorder %s4571_s30, 3 }
   0x4   : > { %p291_p2 = pnand %p3401_p0, %p290_p1 }
   0x5   : > { %v4480_v0 = vld [vmem:[%s5940_s2] sm:$0xff] (!%p291_p2)   ;;  %p329_p3 = scmp.lt.s32.totalorder (!%p291_p2), %s3397_s10, 1  ;;  %v786_v2 = vld [vmem:[%s5939_s1 + $0x50] sm:$0xff] (!%p291_p2)  ;;  %v4573_v3 = vmov (!%p291_p2), 0   ;;  %vm470_vm0 = vcmask (!%p291_p2), 130048   ;;  %v785_v4 = vld [vmem:[%s5939_s1 + $0x48] sm:$0xff] (!%p291_p2) }
   0x6   : > { %294 = sbr.rel (%p291_p2) target bundleno = 935 (0x3a7), region = 52  ;;  %4070 = vmatprep.subr.bf16.mxu0 (!%p291_p2), %v4480_v0  ;;  %4360 = vmatprep.subr.bf16.mxu1 (!%p291_p2), %v4480_v0  ;;  %v784_v1 = vld [vmem:[%s5939_s1 + $0x40] sm:$0xff] (!%p291_p2)  ;;  %v787_v5 = vld [vmem:[%s5939_s1 + $0x58] sm:$0xff] (!%p291_p2)  ;;  %v789_v11 = vld [vmem:[%s5939_s1 + $0x68] sm:$0xff] (!%p291_p2) }
   0x7   : > { %4071 = vmatpush3.bf16.msra.mxu0 (!%p291_p2), %v4480_v0  ;;  %4361 = vmatpush3.bf16.msra.mxu1 (!%p291_p2), %v4480_v0  ;;  %v788_v9 = vld [vmem:[%s5939_s1 + $0x60] sm:$0xff] (!%p291_p2)  ;;  %v790_v14 = vld [vmem:[%s5939_s1 + $0x70] sm:$0xff] (!%p291_p2)  ;;  %v791_v16 = vld [vmem:[%s5939_s1 + $0x78] sm:$0xff] (!%p291_p2) }
   0x8   : > { %4478 = vset.pattern.permute.xlu0 (!%p291_p2), %v4573_v3  ;;  %4479 = vset.pattern.permute.xlu1 (!%p291_p2), %v4573_v3  ;;  %v776_v20 = vld [vmem:[%s5939_s1] sm:$0xff] (!%p291_p2)  ;;  %v777_v21 = vld [vmem:[%s5939_s1 + $0x8] sm:$0xff] (!%p291_p2)  ;;  %v778_v23 = vld [vmem:[%s5939_s1 + $0x10] sm:$0xff] (!%p291_p2) }
   0x9   : > { %850 = vperm.xlu0 (!%p291_p2), %4478, %v784_v1   ;;  %860 = vperm.xlu1 (!%p291_p2), %4479, %v786_v2   ;;  %v779_v26 = vld [vmem:[%s5939_s1 + $0x18] sm:$0xff] (!%p291_p2)  ;;  %v780_v28 = vld [vmem:[%s5939_s1 + $0x20] sm:$0xff] (!%p291_p2)  ;;  %v781_v29 = vld [vmem:[%s5939_s1 + $0x28] sm:$0xff] (!%p291_p2) }
   0xa   : > { %v782_v31 = vld [vmem:[%s5939_s1 + $0x30] sm:$0xff] (!%p291_p2)  ;;  %v783_v33 = vld [vmem:[%s5939_s1 + $0x38] sm:$0xff] (!%p291_p2)  ;;  %v792_v34 = vld [vmem:[%s5939_s1 + $0x80] sm:$0xff] (!%p291_p2) }
   0xb   : > { %v793_v35 = vld [vmem:[%s5939_s1 + $0x88] sm:$0xff] (!%p291_p2)  ;;  %v794_v36 = vld [vmem:[%s5939_s1 + $0x90] sm:$0xff] (!%p291_p2)  ;;  %v795_v37 = vld [vmem:[%s5939_s1 + $0x98] sm:$0xff] (!%p291_p2) }
   0xc   : > { %v796_v38 = vld [vmem:[%s5939_s1 + $0xa0] sm:$0xff] (!%p291_p2)  ;;  %v797_v39 = vld [vmem:[%s5939_s1 + $0xa8] sm:$0xff] (!%p291_p2)  ;;  %v798_v42 = vld [vmem:[%s5939_s1 + $0xb0] sm:$0xff] (!%p291_p2) }
   0xd   : > { %s6021_s10 = smov (!%p329_p3, %s3397_s10), 1  ;;  %855 = vperm.xlu0 %4478, %v785_v4   ;;  %865 = vperm.xlu1 %4479, %v787_v5   ;;  %v4497_v40 = vld [vmem:[%s5942_s4 + $0x20] sm:$0xff]   ;;  %v799_v43 = vld [vmem:[%s5939_s1 + $0xb8] sm:$0xff]  ;;  %v801_v45 = vld [vmem:[%s5939_s1 + $0xc8] sm:$0xff] }
   0xe   : > { %s3760_s17 = sshll.u32 %s6021_s10, 7  ;;  %v4498_v41 = vld [vmem:[%s5942_s4 + $0x60] sm:$0xff]   ;;  %4104 = vmatprep.subr.bf16.mxu1 %v4497_v40  ;;  %v802_v46 = vld [vmem:[%s5939_s1 + $0xd0] sm:$0xff]  ;;  %v803_v47 = vld [vmem:[%s5939_s1 + $0xd8] sm:$0xff]  ;;  %s4446_s12 = smul.u32 56, %s6021_s10 }
   0xf   : > { %s4647_s20 = scalar_lea.vmem %s5938_s0, %s3760_s17  ;;  %4168 = vmatprep.subr.bf16.mxu0 %v4498_v41  ;;  %v800_v44 = vld [vmem:[%s5939_s1 + $0xc0] sm:$0xff]  ;;  %v805_v49 = vld [vmem:[%s5939_s1 + $0xe8] sm:$0xff]  ;;  %v806_v50 = vld [vmem:[%s5939_s1 + $0xf0] sm:$0xff]  ;;  %s336_s26 = scalar_lea.vmem %s5946_s8, %s6021_s10 }
  0x10   : > { %v4481_v6 = vld [vmem:[%s4647_s20] sm:$0xff]   ;;  %v4483_v8 = vld [vmem:[%s4647_s20 + $0x8] sm:$0xff]   ;;  %v4485_v12 = vld [vmem:[%s4647_s20 + $0x10] sm:$0xff]   ;;  %s5547_s25 = scalar_lea.vmem %s5947_s9, %s4446_s12 }
  0x11   : > { %v4482_v7 = vld [vmem:[%s4647_s20 + $0x40] sm:$0xff]   ;;  %4072 = vmatprep.mubr.msk.bf16.mxu0 %vm470_vm0, %v4481_v6  ;;  %v4484_v10 = vld [vmem:[%s4647_s20 + $0x48] sm:$0xff]   ;;  %v4486_v13 = vld [vmem:[%s4647_s20 + $0x50] sm:$0xff]   ;;  %870 = vperm.xlu0 %4478, %v788_v9  }
  0x12   : > { %4088 = vmatprep.mubr.msk.bf16.mxu1 %vm470_vm0, %v4482_v7  ;;  %4073 = vmatmul.mubr.msk.bf16.vlgmr.msra.gmra.mrb[0].mxu0 %vm470_vm0, %v4483_v8  ;;  %v4487_v15 = vld [vmem:[%s4647_s20 + $0x18] sm:$0xff]   ;;  %v4489_v18 = vld [vmem:[%s4647_s20 + $0x20] sm:$0xff]   ;;  %v4491_v22 = vld [vmem:[%s4647_s20 + $0x28] sm:$0xff]  }
  0x13   : > { %4089 = vmatmul.mubr.msk.bf16.vlgmr.msra.gmra.mrb[0].mxu1 %vm470_vm0, %v4484_v10  ;;  %4076 = vmatprep.mubr.msk.bf16.mxu0 %vm470_vm0, %v4485_v12  ;;  %v4488_v17 = vld [vmem:[%s4647_s20 + $0x58] sm:$0xff]   ;;  %v4490_v19 = vld [vmem:[%s4647_s20 + $0x60] sm:$0xff]   ;;  %v4492_v24 = vld [vmem:[%s4647_s20 + $0x68] sm:$0xff]  }
  0x14   : > { %4092 = vmatprep.mubr.msk.bf16.mxu1 %vm470_vm0, %v4486_v13  ;;  %875 = vperm.xlu1 %4479, %v789_v11   ;;  %v4493_v25 = vld [vmem:[%s4647_s20 + $0x30] sm:$0xff]   ;;  %v4495_v30 = vld [vmem:[%s4647_s20 + $0x38] sm:$0xff]   ;;  %v804_v48 = vld [vmem:[%s5939_s1 + $0xe0] sm:$0xff] }
  0x15   : > { %880 = vperm.xlu0 %4478, %v790_v14   ;;  %v4494_v27 = vld [vmem:[%s4647_s20 + $0x70] sm:$0xff]   ;;  %v4496_v32 = vld [vmem:[%s4647_s20 + $0x78] sm:$0xff]   ;;  %4105 = vmatpush3.bf16.msra.mxu1 %v4497_v40  ;;  %v4499_v52 = vld [vmem:[%s5942_s4 + $0x28] sm:$0xff]  }
  0x16   : > { %4169 = vmatpush3.bf16.msra.mxu0 %v4498_v41  ;;  %v807_v51 = vld [vmem:[%s5939_s1 + $0xf8] sm:$0xff]  ;;  %v4500_v53 = vld [vmem:[%s5942_s4 + $0x68] sm:$0xff]   ;;  %4106 = vmatprep.subr.bf16.mxu1 %v4499_v52  ;;  %v4501_v54 = vld [vmem:[%s5942_s4 + $0x30] sm:$0xff]  }
  0x17   : > { %4170 = vmatprep.subr.bf16.mxu0 %v4500_v53  ;;  %v4502_v55 = vld [vmem:[%s5942_s4 + $0x70] sm:$0xff]   ;;  %v4503_v56 = vld [vmem:[%s5942_s4 + $0x38] sm:$0xff]   ;;  %v4798_v58 = vld [vmem:[%s5942_s4] sm:$0xff]  }
  0x18   : > { %885 = vperm.xlu1 %4479, %v791_v16   ;;  %v4504_v57 = vld [vmem:[%s5942_s4 + $0x78] sm:$0xff]   ;;  %v4803_v59 = vld [vmem:[%s5942_s4 + $0x40] sm:$0xff]  }
  0x19   : > { %810 = vperm.xlu0 %4478, %v776_v20   ;;  %4107 = vmatpush3.bf16.msra.mxu1 %v4499_v52 }
  0x1a   : > { %4077 = vmatmul.mubr.msk.bf16.gmra.mrb[4].mxu0 %vm470_vm0, %v4487_v15  ;;  %4108 = vmatprep.subr.bf16.mxu1 %v4501_v54  ;;  %v4836_v15 = vld [vmem:[%s5941_s3] ss:$0 sm:$0xff] }
  0x1b   : > { %4093 = vmatmul.mubr.msk.bf16.gmra.mrb[4].mxu1 %vm470_vm0, %v4488_v17  ;;  %4080 = vmatprep.mubr.msk.bf16.mxu0 %vm470_vm0, %v4489_v18 }
  0x1c   : > { %4096 = vmatprep.mubr.msk.bf16.mxu1 %vm470_vm0, %v4490_v19  ;;  %815 = vperm.xlu1 %4479, %v777_v21  }
  0x1d   : > { %820 = vperm.xlu0 %4478, %v778_v23   ;;  %4171 = vmatpush3.bf16.msra.mxu0 %v4500_v53 }
  0x1e   : > { %4172 = vmatprep.subr.bf16.mxu0 %v4502_v55  ;;  %4109 = vmatpush3.bf16.msra.mxu1 %v4501_v54 }
  0x1f   : > { %4110 = vmatprep.subr.bf16.mxu1 %v4503_v56 }
  0x20   : > { %825 = vperm.xlu1 %4479, %v779_v26  }
  0x21   : > { %830 = vperm.xlu0 %4478, %v780_v28   ;;  %4173 = vmatpush3.bf16.msra.mxu0 %v4502_v55 }
  0x22   : > { %4081 = vmatmul.mubr.msk.bf16.gmra.mrb[8].mxu0 %vm470_vm0, %v4491_v22  ;;  %4174 = vmatprep.subr.bf16.mxu0 %v4504_v57 }
  0x23   : > { %4097 = vmatmul.mubr.msk.bf16.gmra.mrb[8].mxu1 %vm470_vm0, %v4492_v24  ;;  %4084 = vmatprep.mubr.msk.bf16.mxu0 %vm470_vm0, %v4493_v25 }
  0x24   : > { %4100 = vmatprep.mubr.msk.bf16.mxu1 %vm470_vm0, %v4494_v27  ;;  %835 = vperm.xlu1 %4479, %v781_v29  }
  0x25   : > { %840 = vperm.xlu0 %4478, %v782_v31   ;;  %4111 = vmatpush3.bf16.msra.mxu1 %v4503_v56 }
  0x26   : > { %4175 = vmatpush3.bf16.msra.mxu0 %v4504_v57  ;;  %4120 = vmatprep.subr.bf16.mxu1 %v4798_v58 }
  0x27   : > { %4184 = vmatprep.subr.bf16.mxu0 %v4803_v59 }
  0x28   : > { %845 = vperm.xlu1 %4479, %v783_v33  }
  0x29   : > { %890 = vperm.xlu0 %4478, %v792_v34  }
  0x2a   : > { %4085 = vmatmul.mubr.msk.bf16.gmra.mrb[12].mxu0 %vm470_vm0, %v4495_v30 }
  0x2b   : > { %4101 = vmatmul.mubr.msk.bf16.gmra.mrb[12].mxu1 %vm470_vm0, %v4496_v32 }
  0x2c   : > { %895 = vperm.xlu1 %4479, %v793_v35  }
  0x2d   : > { %900 = vperm.xlu0 %4478, %v794_v36  }
  0x30   : > { %905 = vperm.xlu1 %4479, %v795_v37  }
  0x31   : > { %910 = vperm.xlu0 %4478, %v796_v38  }
  0x34   : > { %915 = vperm.xlu1 %4479, %v797_v39  }
  0x35   : > { %920 = vperm.xlu0 %4478, %v798_v42  }
  0x38   : > { %925 = vperm.xlu1 %4479, %v799_v43  }
  0x39   : > { %930 = vperm.xlu0 %4478, %v800_v44  }
  0x3c   : > { %935 = vperm.xlu1 %4479, %v801_v45  }
  0x3d   : > { %940 = vperm.xlu0 %4478, %v802_v46  }
  0x40   : > { %945 = vperm.xlu1 %4479, %v803_v47  }
  0x41   : > { %950 = vperm.xlu0 %4478, %v804_v48  }
  0x44   : > { %955 = vperm.xlu1 %4479, %v805_v49  }
  0x45   : > { %960 = vperm.xlu0 %4478, %v806_v50  }
  0x48   : > { %965 = vperm.xlu1 %4479, %v807_v51  }
  0x88   : > { %v4807_v60 = vpop.permute.xlu0 %850  ;;  %v4809_v61 = vpop.permute.xlu1 %860 }
  0x8c   : > { %v4811_v62 = vpop.permute.xlu0 %855  ;;  %v4813_v63 = vpop.permute.xlu1 %865 }
  0x90   : > { %v4815_v0 = vpop.permute.xlu0 %870 }
  0x93   : > { %v4817_v1 = vpop.permute.xlu1 %875 }
  0x94   : > { %v4819_v2 = vpop.permute.xlu0 %880 }
  0x97   : > { %v4821_v3 = vpop.permute.xlu1 %885 }
  0x98   : > { %v811_v4 = vpop.permute.xlu0 %810 }
  0x9b   : > { %v816_v5 = vpop.permute.xlu1 %815 }
  0x9c   : > { %v821_v6 = vpop.permute.xlu0 %820 }
  0x9f   : > { %v826_v7 = vpop.permute.xlu1 %825 }
  0xa0   : > { %v4823_v8 = vpop.permute.xlu0 %830 }
  0xa3   : > { %v4825_v9 = vpop.permute.xlu1 %835 }
  0xa4   : > { %v4827_v10 = vpop.permute.xlu0 %840 }
  0xa7   : > { %v4829_v11 = vpop.permute.xlu1 %845 }
  0xa8   : > { %v891_v12 = vpop.permute.xlu0 %890 }
  0xab   : > { %v4831_v13 = vpop.permute.xlu1 %895 }
  0xac   : > { %v901_v14 = vpop.permute.xlu0 %900 }
  0xaf   : > { %v4838_v16 = vpop.permute.xlu1 %905 }
  0xb0   : > { %v4840_v17 = vpop.permute.xlu0 %910 }
  0xb3   : > { %v4848_v40 = vpop.permute.xlu1 %915 }
  0xb4   : > { %v4852_v46 = vpop.permute.xlu0 %920 }
  0xe5   : > { %v4074_v18 = vpop.f32.mrb[0].mxu0 }
  0xe6   : > { %v562_v19 = vadd.f32 %v4074_v18, %v4836_v15  ;;  %v553_v20 = vpop.f32.mrb[1].mxu0  ;;  %v4090_v21 = vpop.f32.mrb[0].mxu1 }
  0xe7   : > { %v554_v22 = vadd.f32 %v4836_v15, %v553_v20  ;;  %v4075_v23 = vpop.f32.mrb[2].mxu0  ;;  %v626_v24 = vadd.f32 %v4090_v21, %v4836_v15  ;;  %v617_v25 = vpop.f32.mrb[1].mxu1 }
  0xe8   : > { %vm682_vm1 = vcmp.ge.f32.partialorder %v562_v19, 0.0  ;;  %v714_v26 = vmul.f32 0.2, %v562_v19  ;;  %v565_v27 = vadd.f32 %v4075_v23, %v4836_v15  ;;  %v556_v28 = vpop.f32.mrb[3].mxu0  ;;  %v618_v29 = vadd.f32 %v4836_v15, %v617_v25  ;;  %v4091_v30 = vpop.f32.mrb[2].mxu1 }
  0xe9   : > { %vm680_vm2 = vcmp.ge.f32.partialorder %v554_v22, 0.0  ;;  %v712_v31 = vmul.f32 0.2, %v554_v22  ;;  %v557_v32 = vadd.f32 %v4836_v15, %v556_v28  ;;  %vm698_vm3 = vcmp.ge.f32.partialorder %v626_v24, 0.0  ;;  %v620_v33 = vpop.f32.mrb[3].mxu1 }
  0xea   : > { %v746_v34 = vsel %vm682_vm1, %v562_v19, %v714_v26  ;;  %vm683_vm4 = vcmp.ge.f32.partialorder %v565_v27, 0.0  ;;  %v715_v35 = vmul.f32 0.2, %v565_v27  ;;  %v730_v36 = vmul.f32 0.2, %v626_v24 }
  0xeb   : > { %v970_v37 = vmul.f32 %v821_v6, %v746_v34  ;;  %v744_v38 = vsel %vm680_vm2, %v554_v22, %v712_v31  ;;  %vm681_vm5 = vcmp.ge.f32.partialorder %v557_v32, 0.0  ;;  %v713_v39 = vmul.f32 0.2, %v557_v32  ;;  %v4874_v34 = vpop.permute.xlu0 %930 }
  0xec   : > { %v4850_v41 = vmul.f32 %v811_v4, %v744_v38  ;;  %v747_v42 = vsel %vm683_vm4, %v565_v27, %v715_v35  ;;  %v762_v43 = vsel %vm698_vm3, %v626_v24, %v730_v36  ;;  %vm696_vm6 = vcmp.ge.f32.partialorder %v618_v29, 0.0 }
  0xed   : > { %v971_v44 = vmul.f32 %v826_v7, %v747_v42  ;;  %v745_v45 = vsel %vm681_vm5, %v557_v32, %v713_v39  ;;  %v4078_v47 = vpop.f32.mrb[4].mxu0  ;;  %v986_v48 = vmul.f32 %v901_v14, %v762_v43  ;;  %v728_v49 = vmul.f32 0.2, %v618_v29 }
  0xee   : > { %v4854_v50 = vmul.f32 %v816_v5, %v745_v45  ;;  %v578_v51 = vadd.f32 %v4078_v47, %v4836_v15  ;;  %v569_v52 = vpop.f32.mrb[5].mxu0  ;;  %v629_v53 = vadd.f32 %v4091_v30, %v4836_v15  ;;  %v621_v54 = vadd.f32 %v4836_v15, %v620_v33  ;;  %v4094_v55 = vpop.f32.mrb[4].mxu1 }
  0xef   : > { %v4859_v56 = vpack.c.bf16 %v971_v44, %v970_v37  ;;  %v570_v57 = vadd.f32 %v4836_v15, %v569_v52  ;;  %v760_v4 = vsel %vm696_vm6, %v618_v29, %v728_v49  ;;  %v4079_v6 = vpop.f32.mrb[6].mxu0  ;;  %v642_v7 = vadd.f32 %v4094_v55, %v4836_v15  ;;  %v633_v14 = vpop.f32.mrb[5].mxu1 }
  0xf0   : > { %vm686_vm7 = vcmp.ge.f32.partialorder %v578_v51, 0.0  ;;  %v718_v5 = vmul.f32 0.2, %v578_v51  ;;  %v4863_v18 = vmul.f32 %v891_v12, %v760_v4  ;;  %v581_v19 = vadd.f32 %v4079_v6, %v4836_v15  ;;  %v572_v20 = vpop.f32.mrb[7].mxu0  ;;  %v4095_v21 = vpop.f32.mrb[6].mxu1 }
  0xf1   : > { %vm684_vm8 = vcmp.ge.f32.partialorder %v570_v57, 0.0  ;;  %v716_v22 = vmul.f32 0.2, %v570_v57  ;;  %vm699_vm9 = vcmp.ge.f32.partialorder %v629_v53, 0.0  ;;  %v731_v23 = vmul.f32 0.2, %v629_v53  ;;  %v926_v30 = vpop.permute.xlu1 %925 }
  0xf2   : > { %v750_v24 = vsel %vm686_vm7, %v578_v51, %v718_v5  ;;  %vm687_vm10 = vcmp.ge.f32.partialorder %v581_v19, 0.0  ;;  %v719_v25 = vmul.f32 0.2, %v581_v19  ;;  %v573_v26 = vadd.f32 %v4836_v15, %v572_v20  ;;  %v636_v27 = vpop.f32.mrb[7].mxu1 }
  0xf3   : > { %v4868_v28 = vmul.f32 %v4827_v10, %v750_v24  ;;  %v748_v29 = vsel %vm684_vm8, %v570_v57, %v716_v22  ;;  %v763_v12 = vsel %vm699_vm9, %v629_v53, %v731_v23  ;;  %vm697_vm11 = vcmp.ge.f32.partialorder %v621_v54, 0.0 }
  0xf4   : > { %v4871_v31 = vmul.f32 %v4823_v8, %v748_v29  ;;  %v751_v32 = vsel %vm687_vm10, %v581_v19, %v719_v25  ;;  %v987_v33 = vmul.f32 %v4838_v16, %v763_v12  ;;  %vm685_vm12 = vcmp.ge.f32.partialorder %v573_v26, 0.0  ;;  %v941_v25 = vpop.permute.xlu0 %940 }
  0xf5   : > { %v4877_v35 = vmul.f32 %v4829_v11, %v751_v32  ;;  %v717_v36 = vmul.f32 0.2, %v573_v26  ;;  %v729_v37 = vmul.f32 0.2, %v621_v54  ;;  %vm702_vm13 = vcmp.ge.f32.partialorder %v642_v7, 0.0  ;;  %v4082_v10 = vpop.f32.mrb[8].mxu0  ;;  %v936_v19 = vpop.permute.xlu1 %935 }
  0xf6   : > { %v4879_v38 = vpack.c.bf16 %v987_v33, %v986_v48  ;;  %v734_v39 = vmul.f32 0.2, %v642_v7  ;;  %v634_v42 = vadd.f32 %v4836_v15, %v633_v14  ;;  %v645_v8 = vadd.f32 %v4095_v21, %v4836_v15  ;;  %v4098_v43 = vpop.f32.mrb[8].mxu1  ;;  %v585_v44 = vpop.f32.mrb[9].mxu0 }
  0xf7   : > { %v749_v16 = vsel %vm685_vm12, %v573_v26, %v717_v36  ;;  %v761_v45 = vsel %vm697_vm11, %v621_v54, %v729_v37  ;;  %v637_v47 = vadd.f32 %v4836_v15, %v636_v27  ;;  %v594_v11 = vadd.f32 %v4082_v10, %v4836_v15  ;;  %v649_v49 = vpop.f32.mrb[9].mxu1  ;;  %v4083_v51 = vpop.f32.mrb[10].mxu0 }
  0xf8   : > { %v4887_v52 = vmul.f32 %v4825_v9, %v749_v16  ;;  %v4890_v48 = vmul.f32 %v4831_v13, %v761_v45  ;;  %v766_v53 = vsel %vm702_vm13, %v642_v7, %v734_v39  ;;  %vm700_vm14 = vcmp.ge.f32.partialorder %v634_v42, 0.0  ;;  %v4099_v55 = vpop.f32.mrb[10].mxu1  ;;  %v588_v57 = vpop.f32.mrb[11].mxu0 }
  0xf9   : > { %v4894_v4 = vmul.f32 %v4852_v46, %v766_v53  ;;  %v732_v54 = vmul.f32 0.2, %v634_v42  ;;  %vm703_vm15 = vcmp.ge.f32.partialorder %v645_v8, 0.0  ;;  %v735_v6 = vmul.f32 0.2, %v645_v8  ;;  %v652_v14 = vpop.f32.mrb[11].mxu1 }
  0xfa   : > { %vm701_vm0 = vcmp.ge.f32.partialorder %v637_v47, 0.0  ;;  %v733_v5 = vmul.f32 0.2, %v637_v47  ;;  %vm690_vm1 = vcmp.ge.f32.partialorder %v594_v11, 0.0  ;;  %v722_v9 = vmul.f32 0.2, %v594_v11 }
  0xfb   : > { %v764_v20 = vsel %vm700_vm14, %v634_v42, %v732_v54  ;;  %v767_v13 = vsel %vm703_vm15, %v645_v8, %v735_v6  ;;  %v658_v21 = vadd.f32 %v4098_v43, %v4836_v15  ;;  %v586_v7 = vadd.f32 %v4836_v15, %v585_v44  ;;  %v951_v54 = vpop.permute.xlu0 %950 }
  0xfc   : > { %v4899_v22 = vmul.f32 %v4840_v17, %v764_v20  ;;  %v4901_v46 = vmul.f32 %v926_v30, %v767_v13  ;;  %v765_v23 = vsel %vm701_vm0, %v637_v47, %v733_v5  ;;  %v754_v24 = vsel %vm690_vm1, %v594_v11, %v722_v9  ;;  %v946_v47 = vpop.permute.xlu1 %945 }
  0xfd   : > { %v4904_v26 = vmul.f32 %v4848_v40, %v765_v23  ;;  %v978_v27 = vmul.f32 %v4809_v61, %v754_v24  ;;  %vm706_vm2 = vcmp.ge.f32.partialorder %v658_v21, 0.0  ;;  %v738_v29 = vmul.f32 0.2, %v658_v21  ;;  %v4086_v12 = vpop.f32.mrb[12].mxu0 }
  0xfe   : > { %vm688_vm3 = vcmp.ge.f32.partialorder %v586_v7, 0.0  ;;  %v720_v32 = vmul.f32 0.2, %v586_v7  ;;  %v650_v33 = vadd.f32 %v4836_v15, %v649_v49  ;;  %v597_v17 = vadd.f32 %v4083_v51, %v4836_v15  ;;  %v4102_v36 = vpop.f32.mrb[12].mxu1  ;;  %v601_v30 = vpop.f32.mrb[13].mxu0 }
  0xff   : > { %v770_v37 = vsel %vm706_vm2, %v658_v21, %v738_v29  ;;  %v661_v10 = vadd.f32 %v4099_v55, %v4836_v15  ;;  %v589_v39 = vadd.f32 %v4836_v15, %v588_v57  ;;  %v653_v40 = vadd.f32 %v4836_v15, %v652_v14  ;;  %v665_v42 = vpop.f32.mrb[13].mxu1  ;;  %v4087_v61 = vpop.f32.mrb[14].mxu0 }
 0x100   : > { %v994_v8 = vmul.f32 %v941_v25, %v770_v37  ;;  %v752_v43 = vsel %vm688_vm3, %v586_v7, %v720_v32  ;;  %vm704_vm4 = vcmp.ge.f32.partialorder %v650_v33, 0.0  ;;  %v736_v44 = vmul.f32 0.2, %v650_v33  ;;  %v4103_v16 = vpop.f32.mrb[14].mxu1  ;;  %v604_v45 = vpop.f32.mrb[15].mxu0 }
 0x101   : > { %v976_v11 = vmul.f32 %v4807_v60, %v752_v43  ;;  %vm691_vm5 = vcmp.ge.f32.partialorder %v597_v17, 0.0  ;;  %v723_v49 = vmul.f32 0.2, %v597_v17  ;;  %vm707_vm6 = vcmp.ge.f32.partialorder %v661_v10, 0.0  ;;  %v668_v51 = vpop.f32.mrb[15].mxu1  ;;  %v956_v32 = vpop.permute.xlu1 %955 }
 0x102   : > { %v768_v53 = vsel %vm704_vm4, %v650_v33, %v736_v44  ;;  %v739_v55 = vmul.f32 0.2, %v661_v10  ;;  %vm689_vm7 = vcmp.ge.f32.partialorder %v589_v39, 0.0  ;;  %v721_v57 = vmul.f32 0.2, %v589_v39 }
 0x103   : > { %v4914_v6 = vmul.f32 %v4874_v34, %v768_v53  ;;  %v755_v14 = vsel %vm691_vm5, %v597_v17, %v723_v49  ;;  %vm705_vm8 = vcmp.ge.f32.partialorder %v653_v40, 0.0  ;;  %v737_v5 = vmul.f32 0.2, %v653_v40 }
 0x104   : > { %v979_v9 = vmul.f32 %v4813_v63, %v755_v14  ;;  %v771_v20 = vsel %vm707_vm6, %v661_v10, %v739_v55  ;;  %v753_v13 = vsel %vm689_vm7, %v589_v39, %v721_v57  ;;  %v610_v60 = vadd.f32 %v4086_v12, %v4836_v15 }
 0x105   : > { %vm1057_vm9 = vcmask 523264   ;;  %v995_v21 = vmul.f32 %v946_v47, %v771_v20  ;;  %v977_v7 = vmul.f32 %v4811_v62, %v753_v13  ;;  %v769_v23 = vsel %vm705_vm8, %v653_v40, %v737_v5  ;;  %v966_v49 = vpop.permute.xlu1 %965  ;;  %v4509_v13 = vld [vmem:[%s5942_s4 + $0x10] sm:$0xff]  }
 0x106   : > { %v674_v24 = vadd.f32 %v4102_v36, %v4836_v15  ;;  %v4920_v25 = vpack.c.bf16 %v979_v9, %v978_v27  ;;  %v4922_v34 = vmul.f32 %v936_v19, %v769_v23  ;;  %vm694_vm10 = vcmp.ge.f32.partialorder %v610_v60, 0.0  ;;  %v961_v27 = vpop.permute.xlu0 %960  ;;  %v4519_v23 = vld [vmem:[%s5942_s4 + $0x98] sm:$0xff]  }
 0x107   : > { %v726_v29 = vmul.f32 0.2, %v610_v60  ;;  %v4924_v33 = vpack.c.bf16 %v995_v21, %v994_v8  ;;  %v602_v12 = vadd.f32 %v4836_v15, %v601_v30  ;;  %v666_v37 = vadd.f32 %v4836_v15, %v665_v42  ;;  %v4517_v21 = vld [vmem:[%s5942_s4 + $0x90] sm:$0xff]  }
 0x108   : > { %vm710_vm11 = vcmp.ge.f32.partialorder %v674_v24, 0.0  ;;  %v742_v63 = vmul.f32 0.2, %v674_v24  ;;  %v613_v62 = vadd.f32 %v4087_v61, %v4836_v15  ;;  %v677_v36 = vadd.f32 %v4103_v16, %v4836_v15 }
 0x109   : > { %v758_v17 = vsel %vm694_vm10, %v610_v60, %v726_v29  ;;  %vm692_vm12 = vcmp.ge.f32.partialorder %v602_v12, 0.0  ;;  %v724_v39 = vmul.f32 0.2, %v602_v12  ;;  %vm708_vm13 = vcmp.ge.f32.partialorder %v666_v37, 0.0  ;;  %v4516_v60 = vld [vmem:[%s5942_s4 + $0xc8] sm:$0xff]   ;;  %v4522_v29 = vld [vmem:[%s5942_s4 + $0xe0] sm:$0xff]  }
 0x10a   : > { %v982_v19 = vmul.f32 %v4819_v2, %v758_v17  ;;  %v774_v10 = vsel %vm710_vm11, %v674_v24, %v742_v63  ;;  %v740_v8 = vmul.f32 0.2, %v666_v37  ;;  %vm695_vm14 = vcmp.ge.f32.partialorder %v613_v62, 0.0  ;;  %v4520_v24 = vld [vmem:[%s5942_s4 + $0xd8] sm:$0xff]   ;;  %v4524_v63 = vld [vmem:[%s5942_s4 + $0xe8] sm:$0xff]   ;;  %v4526_v17 = vld [vmem:[%s5942_s4 + $0xf0] sm:$0xff]  }
 0x10b   : > { %v998_v40 = vmul.f32 %v961_v27, %v774_v10  ;;  %v756_v43 = vsel %vm692_vm12, %v602_v12, %v724_v39  ;;  %v727_v44 = vmul.f32 0.2, %v613_v62  ;;  %vm711_vm15 = vcmp.ge.f32.partialorder %v677_v36, 0.0  ;;  %v4525_v12 = vld [vmem:[%s5942_s4 + $0xb0] sm:$0xff]   ;;  %v4530_v27 = vld [vmem:[%s5942_s4 + $0x160] sm:$0xff]   ;;  %v4532_v10 = vld [vmem:[%s5942_s4 + $0x168] sm:$0xff]  }
 0x10c   : > { %v743_v30 = vmul.f32 0.2, %v677_v36  ;;  %v980_v42 = vmul.f32 %v4815_v0, %v756_v43  ;;  %v772_v47 = vsel %vm708_vm13, %v666_v37, %v740_v8  ;;  %v605_v61 = vadd.f32 %v4836_v15, %v604_v45  ;;  %v4507_v0 = vld [vmem:[%s5942_s4 + $0x8] sm:$0xff]   ;;  %v4527_v37 = vld [vmem:[%s5942_s4 + $0xb8] sm:$0xff]   ;;  %v4533_v39 = vld [vmem:[%s5942_s4 + $0x130] sm:$0xff]  }
 0x10d   : > { %v669_v16 = vadd.f32 %v4836_v15, %v668_v51  ;;  %v996_v2 = vmul.f32 %v951_v54, %v772_v47  ;;  %v759_v53 = vsel %vm695_vm14, %v613_v62, %v727_v44  ;;  %v4934_v57 = vpack.c.bf16 %v977_v7, %v976_v11  ;;  %v4508_v45 = vld [vmem:[%s5942_s4 + $0x48] sm:$0xff]   ;;  %v4518_v7 = vld [vmem:[%s5942_s4 + $0xd0] sm:$0xff]   ;;  %v4528_v62 = vld [vmem:[%s5942_s4 + $0xf8] sm:$0xff]  }
 0x10e   : > { %v775_v55 = vsel %vm711_vm15, %v677_v36, %v743_v30  ;;  %v983_v14 = vmul.f32 %v4821_v3, %v759_v53  ;;  %vm693_vm0 = vcmp.ge.f32.partialorder %v605_v61, 0.0  ;;  %v725_v9 = vmul.f32 0.2, %v605_v61  ;;  %v4529_v36 = vld [vmem:[%s5942_s4 + $0x120] sm:$0xff]   ;;  %v4535_v8 = vld [vmem:[%s5942_s4 + $0x138] sm:$0xff]   ;;  %v4540_v47 = vld [vmem:[%s5942_s4 + $0x148] sm:$0xff]  }
 0x10f   : > { %v999_v5 = vmul.f32 %v966_v49, %v775_v55  ;;  %vm709_vm1 = vcmp.ge.f32.partialorder %v669_v16, 0.0  ;;  %v741_v15 = vmul.f32 0.2, %v669_v16  ;;  %4112 = vmatprep.mubr.msk.bf16.mxu1 %vm1057_vm9, %v4934_v57  ;;  %4176 = vmatprep.mubr.msk.bf16.mxu0 %vm1057_vm9, %v4934_v57  ;;  %v4949_v3 = vpack.c.bf16 %v4854_v50, %v4850_v41  ;;  %v4536_v43 = vld [vmem:[%s5942_s4 + $0x178] sm:$0xff]   ;;  %v4537_v44 = vld [vmem:[%s5942_s4 + $0x100] sm:$0xff]   ;;  %v4547_v55 = vld [vmem:[%s5942_s4 + $0x188] sm:$0xff]  }
 0x110   : > { %v4953_v11 = vpack.c.bf16 %v4887_v52, %v4871_v31  ;;  %v757_v51 = vsel %vm693_vm0, %v605_v61, %v725_v9  ;;  %4113 = vmatmul.mubr.msk.bf16.vlgmr.msra.gmra.mrb[16].mxu1 %vm1057_vm9, %v4920_v25  ;;  %4177 = vmatmul.mubr.msk.bf16.vlgmr.msra.gmra.mrb[16].mxu0 %vm1057_vm9, %v4920_v25  ;;  %v4959_v54 = vpack.c.bf16 %v983_v14, %v982_v19  ;;  %v4531_v19 = vld [vmem:[%s5942_s4 + $0x128] sm:$0xff]   ;;  %v4538_v30 = vld [vmem:[%s5942_s4 + $0x140] sm:$0xff]   ;;  %v4541_v61 = vld [vmem:[%s5942_s4 + $0x110] sm:$0xff]   ;;  %vm2801_vm2 = vcmask 1046528  }
 0x111   : > { %v4963_v20 = vpack.c.bf16 %v4877_v35, %v4868_v28  ;;  %v981_v41 = vmul.f32 %v4817_v1, %v757_v51  ;;  %v773_v50 = vsel %vm709_vm1, %v669_v16, %v741_v15  ;;  %4121 = vmatpush3.bf16.msra.mxu1 %v4798_v58  ;;  %4185 = vmatpush3.bf16.msra.mxu0 %v4803_v59  ;;  %v4510_v1 = vld [vmem:[%s5942_s4 + $0x50] sm:$0xff]   ;;  %v4544_v49 = vld [vmem:[%s5942_s4 + $0x158] sm:$0xff]   ;;  %v4546_v53 = vld [vmem:[%s5942_s4 + $0x1c0] sm:$0xff]  }
 0x112   : > { %v4970_v31 = vpack.c.bf16 %v4890_v48, %v4863_v18  ;;  %v997_v52 = vmul.f32 %v956_v32, %v773_v50  ;;  %4122 = vmatprep.subr.bf16.mxu1 %v4507_v0  ;;  %4186 = vmatprep.subr.bf16.mxu0 %v4508_v45  ;;  %v4977_v28 = vpack.c.bf16 %v4904_v26, %v4899_v22  ;;  %v4512_v22 = vld [vmem:[%s5942_s4 + $0x58] sm:$0xff]   ;;  %v4514_v26 = vld [vmem:[%s5942_s4 + $0xc0] sm:$0xff]   ;;  %v4523_v32 = vld [vmem:[%s5942_s4 + $0xa8] sm:$0xff]  }
 0x113   : > { %v4981_v58 = vpack.c.bf16 %v4901_v46, %v4894_v4  ;;  %v4983_v59 = vpack.c.bf16 %v981_v41, %v980_v42  ;;  %v4990_v18 = vpack.c.bf16 %v4922_v34, %v4914_v6  ;;  %v4992_v35 = vpack.c.bf16 %v999_v5, %v998_v40  ;;  %v4511_v4 = vld [vmem:[%s5942_s4 + $0x18] sm:$0xff]   ;;  %v4513_v46 = vld [vmem:[%s5942_s4 + $0x80] sm:$0xff]   ;;  %v4515_v6 = vld [vmem:[%s5942_s4 + $0x88] sm:$0xff]  }
 0x114   : > { %v4994_v48 = vpack.c.bf16 %v997_v52, %v996_v2  ;;  %v4521_v34 = vld [vmem:[%s5942_s4 + $0xa0] sm:$0xff]   ;;  %v4534_v40 = vld [vmem:[%s5942_s4 + $0x170] sm:$0xff]   ;;  %v4539_v42 = vld [vmem:[%s5942_s4 + $0x108] sm:$0xff]  }
 0x115   : > { %4123 = vmatpush3.bf16.msra.mxu1 %v4507_v0  ;;  %4187 = vmatpush3.bf16.msra.mxu0 %v4508_v45  ;;  %v4542_v16 = vld [vmem:[%s5942_s4 + $0x150] sm:$0xff]   ;;  %v4545_v2 = vld [vmem:[%s5942_s4 + $0x180] sm:$0xff]   ;;  %v4552_v9 = vld [vmem:[%s5942_s4 + $0x1d8] sm:$0xff]  }
 0x116   : > { %4116 = vmatprep.mubr.msk.bf16.mxu1 %vm1057_vm9, %v4983_v59  ;;  %4124 = vmatprep.subr.bf16.mxu1 %v4509_v13  ;;  %v4549_v14 = vld [vmem:[%s5942_s4 + $0x190] sm:$0xff]   ;;  %v4553_v0 = vld [vmem:[%s5942_s4 + $0x1a0] sm:$0xff]   ;;  %v4555_v15 = vld [vmem:[%s5942_s4 + $0x1a8] sm:$0xff]  }
 0x117   : > { %4180 = vmatprep.mubr.msk.bf16.mxu0 %vm1057_vm9, %v4983_v59  ;;  %4188 = vmatprep.subr.bf16.mxu0 %v4510_v1  ;;  %v4550_v5 = vld [vmem:[%s5942_s4 + $0x1d0] sm:$0xff]   ;;  %v4554_v45 = vld [vmem:[%s5942_s4 + $0x1e0] sm:$0xff]  }
 0x118   : > { %4117 = vmatmul.mubr.msk.bf16.gmra.mrb[20].mxu1 %vm1057_vm9, %v4959_v54  ;;  %4181 = vmatmul.mubr.msk.bf16.gmra.mrb[20].mxu0 %vm1057_vm9, %v4959_v54  ;;  %v4558_v51 = vld [vmem:[%s5942_s4 + $0x1f0] sm:$0xff]  }
 0x119   : > { %4125 = vmatpush3.bf16.msra.mxu1 %v4509_v13  ;;  %4189 = vmatpush3.bf16.msra.mxu0 %v4510_v1 }
 0x11a   : > { %4128 = vmatprep.mubr.msk.bf16.mxu1 %vm1057_vm9, %v4949_v3  ;;  %4192 = vmatprep.mubr.msk.bf16.mxu0 %vm1057_vm9, %v4949_v3 }
 0x11b   : > { %4126 = vmatprep.subr.bf16.mxu1 %v4511_v4  ;;  %4190 = vmatprep.subr.bf16.mxu0 %v4512_v22 }
 0x11d   : > { %4127 = vmatpush3.bf16.msra.mxu1 %v4511_v4  ;;  %4191 = vmatpush3.bf16.msra.mxu0 %v4512_v22 }
 0x11e   : > { %4136 = vmatprep.subr.bf16.mxu1 %v4513_v46  ;;  %4200 = vmatprep.subr.bf16.mxu0 %v4514_v26 }
 0x120   : > { %4129 = vmatmul.mubr.msk.bf16.vlgmr.msra.gmra.mrb[16].mxu1 %vm1057_vm9, %v4859_v56  ;;  %4193 = vmatmul.mubr.msk.bf16.vlgmr.msra.gmra.mrb[16].mxu0 %vm1057_vm9, %v4859_v56 }
 0x121   : > { %4137 = vmatpush3.bf16.msra.mxu1 %v4513_v46  ;;  %4201 = vmatpush3.bf16.msra.mxu0 %v4514_v26 }
 0x122   : > { %4132 = vmatprep.mubr.msk.bf16.mxu1 %vm1057_vm9, %v4953_v11  ;;  %4196 = vmatprep.mubr.msk.bf16.mxu0 %vm1057_vm9, %v4953_v11 }
 0x123   : > { %4138 = vmatprep.subr.bf16.mxu1 %v4515_v6  ;;  %4202 = vmatprep.subr.bf16.mxu0 %v4516_v60 }
 0x125   : > { %4139 = vmatpush3.bf16.msra.mxu1 %v4515_v6  ;;  %4203 = vmatpush3.bf16.msra.mxu0 %v4516_v60 }
 0x126   : > { %4140 = vmatprep.subr.bf16.mxu1 %v4517_v21  ;;  %4204 = vmatprep.subr.bf16.mxu0 %v4518_v7 }
 0x128   : > { %4133 = vmatmul.mubr.msk.bf16.gmra.mrb[24].mxu1 %vm1057_vm9, %v4963_v20  ;;  %4197 = vmatmul.mubr.msk.bf16.gmra.mrb[20].mxu0 %vm1057_vm9, %v4963_v20 }
 0x129   : > { %4141 = vmatpush3.bf16.msra.mxu1 %v4517_v21  ;;  %4205 = vmatpush3.bf16.msra.mxu0 %v4518_v7 }
 0x12a   : > { %4144 = vmatprep.mubr.msk.bf16.mxu1 %vm1057_vm9, %v4970_v31  ;;  %4208 = vmatprep.mubr.msk.bf16.mxu0 %vm1057_vm9, %v4970_v31 }
 0x12b   : > { %4142 = vmatprep.subr.bf16.mxu1 %v4519_v23  ;;  %4206 = vmatprep.subr.bf16.mxu0 %v4520_v24 }
 0x12d   : > { %4143 = vmatpush3.bf16.msra.mxu1 %v4519_v23  ;;  %4207 = vmatpush3.bf16.msra.mxu0 %v4520_v24 }
 0x12e   : > { %4152 = vmatprep.subr.bf16.mxu1 %v4521_v34  ;;  %4216 = vmatprep.subr.bf16.mxu0 %v4522_v29 }
 0x130   : > { %4145 = vmatmul.mubr.msk.bf16.vlgmr.msra.gmra.mrb[16].mxu1 %vm1057_vm9, %v4879_v38  ;;  %4209 = vmatmul.mubr.msk.bf16.vlgmr.msra.gmra.mrb[16].mxu0 %vm1057_vm9, %v4879_v38 }
 0x131   : > { %4153 = vmatpush3.bf16.msra.mxu1 %v4521_v34  ;;  %4217 = vmatpush3.bf16.msra.mxu0 %v4522_v29 }
 0x132   : > { %4148 = vmatprep.mubr.msk.bf16.mxu1 %vm1057_vm9, %v4977_v28  ;;  %4212 = vmatprep.mubr.msk.bf16.mxu0 %vm1057_vm9, %v4977_v28 }
 0x133   : > { %4154 = vmatprep.subr.bf16.mxu1 %v4523_v32  ;;  %4218 = vmatprep.subr.bf16.mxu0 %v4524_v63 }
 0x135   : > { %4155 = vmatpush3.bf16.msra.mxu1 %v4523_v32  ;;  %4219 = vmatpush3.bf16.msra.mxu0 %v4524_v63 }
 0x136   : > { %4156 = vmatprep.subr.bf16.mxu1 %v4525_v12  ;;  %4220 = vmatprep.subr.bf16.mxu0 %v4526_v17 }
 0x138   : > { %4149 = vmatmul.mubr.msk.bf16.gmra.mrb[28].mxu1 %vm1057_vm9, %v4981_v58  ;;  %4213 = vmatmul.mubr.msk.bf16.gmra.mrb[20].mxu0 %vm1057_vm9, %v4981_v58 }
 0x139   : > { %4157 = vmatpush3.bf16.msra.mxu1 %v4525_v12  ;;  %4221 = vmatpush3.bf16.msra.mxu0 %v4526_v17 }
 0x13a   : > { %4160 = vmatprep.mubr.msk.bf16.mxu1 %vm1057_vm9, %v4990_v18  ;;  %4224 = vmatprep.mubr.msk.bf16.mxu0 %vm1057_vm9, %v4990_v18 }
 0x13b   : > { %4158 = vmatprep.subr.bf16.mxu1 %v4527_v37  ;;  %4222 = vmatprep.subr.bf16.mxu0 %v4528_v62 }
 0x13d   : > { %4159 = vmatpush3.bf16.msra.mxu1 %v4527_v37  ;;  %4223 = vmatpush3.bf16.msra.mxu0 %v4528_v62 }
 0x13e   : > { %4232 = vmatprep.subr.bf16.mxu1 %v4529_v36  ;;  %4296 = vmatprep.subr.bf16.mxu0 %v4530_v27 }
 0x140   : > { %4161 = vmatmul.mubr.msk.bf16.vlgmr.msra.gmra.mrb[16].mxu1 %vm1057_vm9, %v4924_v33  ;;  %4225 = vmatmul.mubr.msk.bf16.vlgmr.msra.gmra.mrb[16].mxu0 %vm1057_vm9, %v4924_v33 }
 0x141   : > { %4233 = vmatpush3.bf16.msra.mxu1 %v4529_v36  ;;  %4297 = vmatpush3.bf16.msra.mxu0 %v4530_v27 }
 0x142   : > { %4164 = vmatprep.mubr.msk.bf16.mxu1 %vm1057_vm9, %v4994_v48  ;;  %4228 = vmatprep.mubr.msk.bf16.mxu0 %vm1057_vm9, %v4994_v48 }
 0x143   : > { %4234 = vmatprep.subr.bf16.mxu1 %v4531_v19  ;;  %4298 = vmatprep.subr.bf16.mxu0 %v4532_v10 }
 0x145   : > { %4235 = vmatpush3.bf16.msra.mxu1 %v4531_v19  ;;  %4299 = vmatpush3.bf16.msra.mxu0 %v4532_v10 }
 0x146   : > { %4236 = vmatprep.subr.bf16.mxu1 %v4533_v39  ;;  %4300 = vmatprep.subr.bf16.mxu0 %v4534_v40 }
 0x148   : > { %4165 = vmatmul.mubr.msk.bf16.gmra.mrb[32].mxu1 %vm1057_vm9, %v4992_v35  ;;  %4229 = vmatmul.mubr.msk.bf16.gmra.mrb[20].mxu0 %vm1057_vm9, %v4992_v35 }
 0x149   : > { %4237 = vmatpush3.bf16.msra.mxu1 %v4533_v39  ;;  %4301 = vmatpush3.bf16.msra.mxu0 %v4534_v40 }
 0x14a   : > { %4240 = vmatprep.mubr.msk.bf16.mxu1 %vm1057_vm9, %v4934_v57  ;;  %4304 = vmatprep.mubr.msk.bf16.mxu0 %vm1057_vm9, %v4934_v57  ;;  %v4548_v57 = vld [vmem:[%s5942_s4 + $0x1c8] sm:$0xff]  }
 0x14b   : > { %4238 = vmatprep.subr.bf16.mxu1 %v4535_v8  ;;  %4302 = vmatprep.subr.bf16.mxu0 %v4536_v43 }
 0x14d   : > { %4239 = vmatpush3.bf16.msra.mxu1 %v4535_v8  ;;  %4303 = vmatpush3.bf16.msra.mxu0 %v4536_v43 }
 0x14e   : > { %4248 = vmatprep.subr.bf16.mxu1 %v4537_v44  ;;  %4312 = vmatprep.subr.bf16.mxu0 %v4538_v30 }
 0x150   : > { %4241 = vmatmul.mubr.msk.bf16.vlgmr.msra.gmra.mrb[36].mxu1 %vm1057_vm9, %v4920_v25  ;;  %4305 = vmatmul.mubr.msk.bf16.vlgmr.msra.gmra.mrb[24].mxu0 %vm1057_vm9, %v4920_v25  ;;  %v4543_v25 = vld [vmem:[%s5942_s4 + $0x118] sm:$0xff]  }
 0x151   : > { %4249 = vmatpush3.bf16.msra.mxu1 %v4537_v44  ;;  %4313 = vmatpush3.bf16.msra.mxu0 %v4538_v30 }
 0x152   : > { %4244 = vmatprep.mubr.msk.bf16.mxu1 %vm1057_vm9, %v4983_v59  ;;  %4308 = vmatprep.mubr.msk.bf16.mxu0 %vm1057_vm9, %v4983_v59 }
 0x153   : > { %4250 = vmatprep.subr.bf16.mxu1 %v4539_v42  ;;  %4314 = vmatprep.subr.bf16.mxu0 %v4540_v47 }
 0x155   : > { %4251 = vmatpush3.bf16.msra.mxu1 %v4539_v42  ;;  %4315 = vmatpush3.bf16.msra.mxu0 %v4540_v47 }
 0x156   : > { %4252 = vmatprep.subr.bf16.mxu1 %v4541_v61  ;;  %4316 = vmatprep.subr.bf16.mxu0 %v4542_v16 }
 0x158   : > { %4245 = vmatmul.mubr.msk.bf16.gmra.mrb[40].mxu1 %vm1057_vm9, %v4959_v54  ;;  %4309 = vmatmul.mubr.msk.bf16.gmra.mrb[28].mxu0 %vm1057_vm9, %v4959_v54  ;;  %v4560_v54 = vld [vmem:[%s5942_s4 + $0x1f8] sm:$0xff]  }
 0x159   : > { %4253 = vmatpush3.bf16.msra.mxu1 %v4541_v61  ;;  %4317 = vmatpush3.bf16.msra.mxu0 %v4542_v16 }
 0x15a   : > { %4256 = vmatprep.mubr.msk.bf16.mxu1 %vm1057_vm9, %v4949_v3  ;;  %4320 = vmatprep.mubr.msk.bf16.mxu0 %vm1057_vm9, %v4949_v3  ;;  %v4556_v3 = vld [vmem:[%s5942_s4 + $0x1e8] sm:$0xff]  }
 0x15b   : > { %4254 = vmatprep.subr.bf16.mxu1 %v4543_v25  ;;  %4318 = vmatprep.subr.bf16.mxu0 %v4544_v49 }
 0x15d   : > { %4255 = vmatpush3.bf16.msra.mxu1 %v4543_v25  ;;  %4319 = vmatpush3.bf16.msra.mxu0 %v4544_v49 }
 0x15e   : > { %4264 = vmatprep.subr.bf16.mxu1 %v4545_v2  ;;  %4328 = vmatprep.subr.bf16.mxu0 %v4546_v53 }
 0x160   : > { %4257 = vmatmul.mubr.msk.bf16.vlgmr.msra.gmra.mrb[36].mxu1 %vm1057_vm9, %v4859_v56  ;;  %4321 = vmatmul.mubr.msk.bf16.vlgmr.msra.gmra.mrb[24].mxu0 %vm1057_vm9, %v4859_v56  ;;  %v4551_v56 = vld [vmem:[%s5942_s4 + $0x198] sm:$0xff]  }
 0x161   : > { %4265 = vmatpush3.bf16.msra.mxu1 %v4545_v2  ;;  %4329 = vmatpush3.bf16.msra.mxu0 %v4546_v53 }
 0x162   : > { %4260 = vmatprep.mubr.msk.bf16.mxu1 %vm1057_vm9, %v4953_v11  ;;  %4324 = vmatprep.mubr.msk.bf16.mxu0 %vm1057_vm9, %v4953_v11  ;;  %v4557_v11 = vld [vmem:[%s5942_s4 + $0x1b0] sm:$0xff]  }
 0x163   : > { %4266 = vmatprep.subr.bf16.mxu1 %v4547_v55  ;;  %4330 = vmatprep.subr.bf16.mxu0 %v4548_v57 }
 0x165   : > { %4267 = vmatpush3.bf16.msra.mxu1 %v4547_v55  ;;  %4331 = vmatpush3.bf16.msra.mxu0 %v4548_v57  ;;  %v5283_v57 = vld [vmem:[%s5944_s6 + $0x20] sm:$0xff]  }
 0x166   : > { %4268 = vmatprep.subr.bf16.mxu1 %v4549_v14  ;;  %4332 = vmatprep.subr.bf16.mxu0 %v4550_v5 }
 0x168   : > { %4261 = vmatmul.mubr.msk.bf16.gmra.mrb[40].mxu1 %vm1057_vm9, %v4963_v20  ;;  %4325 = vmatmul.mubr.msk.bf16.gmra.mrb[28].mxu0 %vm1057_vm9, %v4963_v20 }
 0x169   : > { %4269 = vmatpush3.bf16.msra.mxu1 %v4549_v14  ;;  %4333 = vmatpush3.bf16.msra.mxu0 %v4550_v5  ;;  %v5288_v14 = vld [vmem:[%s5944_s6 + $0x18] sm:$0xff]   ;;  %v5293_v5 = vld [vmem:[%s5944_s6 + $0x28] sm:$0xff]  }
 0x16a   : > { %4272 = vmatprep.mubr.msk.bf16.mxu1 %vm1057_vm9, %v4970_v31  ;;  %4336 = vmatprep.mubr.msk.bf16.mxu0 %vm1057_vm9, %v4970_v31 }
 0x16b   : > { %4270 = vmatprep.subr.bf16.mxu1 %v4551_v56  ;;  %4334 = vmatprep.subr.bf16.mxu0 %v4552_v9 }
 0x16d   : > { %4271 = vmatpush3.bf16.msra.mxu1 %v4551_v56  ;;  %4335 = vmatpush3.bf16.msra.mxu0 %v4552_v9  ;;  %v5298_v56 = vld [vmem:[%s5944_s6 + $0x30] sm:$0xff]   ;;  %v5303_v9 = vld [vmem:[%s5944_s6] sm:$0xff]  }
 0x16e   : > { %4280 = vmatprep.subr.bf16.mxu1 %v4553_v0  ;;  %4344 = vmatprep.subr.bf16.mxu0 %v4554_v45 }
 0x170   : > { %4273 = vmatmul.mubr.msk.bf16.vlgmr.msra.gmra.mrb[36].mxu1 %vm1057_vm9, %v4879_v38  ;;  %4337 = vmatmul.mubr.msk.bf16.vlgmr.msra.gmra.mrb[24].mxu0 %vm1057_vm9, %v4879_v38  ;;  %v4559_v38 = vld [vmem:[%s5942_s4 + $0x1b8] sm:$0xff]  }
 0x171   : > { %4281 = vmatpush3.bf16.msra.mxu1 %v4553_v0  ;;  %4345 = vmatpush3.bf16.msra.mxu0 %v4554_v45  ;;  %v5308_v0 = vld [vmem:[%s5944_s6 + $0x70] sm:$0xff]   ;;  %v5313_v45 = vld [vmem:[%s5944_s6 + $0x38] sm:$0xff]  }
 0x172   : > { %4276 = vmatprep.mubr.msk.bf16.mxu1 %vm1057_vm9, %v4977_v28  ;;  %4340 = vmatprep.mubr.msk.bf16.mxu0 %vm1057_vm9, %v4977_v28 }
 0x173   : > { %4282 = vmatprep.subr.bf16.mxu1 %v4555_v15  ;;  %4346 = vmatprep.subr.bf16.mxu0 %v4556_v3 }
 0x175   : > { %4283 = vmatpush3.bf16.msra.mxu1 %v4555_v15  ;;  %4347 = vmatpush3.bf16.msra.mxu0 %v4556_v3  ;;  %v5319_v3 = vld [vmem:[%s5944_s6 + $0x8] sm:$0xff]  }
 0x176   : > { %4284 = vmatprep.subr.bf16.mxu1 %v4557_v11  ;;  %4348 = vmatprep.subr.bf16.mxu0 %v4558_v51 }
 0x178   : > { %4277 = vmatmul.mubr.msk.bf16.gmra.mrb[40].mxu1 %vm1057_vm9, %v4981_v58  ;;  %4341 = vmatmul.mubr.msk.bf16.gmra.mrb[28].mxu0 %vm1057_vm9, %v4981_v58 }
 0x179   : > { %4285 = vmatpush3.bf16.msra.mxu1 %v4557_v11  ;;  %4349 = vmatpush3.bf16.msra.mxu0 %v4558_v51  ;;  %v5324_v11 = vld [vmem:[%s5944_s6 + $0x78] sm:$0xff]   ;;  %v5329_v51 = vld [vmem:[%s5944_s6 + $0x40] sm:$0xff]  }
 0x17a   : > { %4288 = vmatprep.mubr.msk.bf16.mxu1 %vm1057_vm9, %v4990_v18  ;;  %4352 = vmatprep.mubr.msk.bf16.mxu0 %vm1057_vm9, %v4990_v18 }
 0x17b   : > { %4286 = vmatprep.subr.bf16.mxu1 %v4559_v38  ;;  %4350 = vmatprep.subr.bf16.mxu0 %v4560_v54 }
 0x17d   : > { %4287 = vmatpush3.bf16.msra.mxu1 %v4559_v38  ;;  %4351 = vmatpush3.bf16.msra.mxu0 %v4560_v54 }
 0x180   : > { %4289 = vmatmul.mubr.msk.bf16.vlgmr.msra.gmra.mrb[36].mxu1 %vm1057_vm9, %v4924_v33  ;;  %4353 = vmatmul.mubr.msk.bf16.vlgmr.msra.gmra.mrb[24].mxu0 %vm1057_vm9, %v4924_v33 }
 0x181   : > { %4292 = vmatprep.mubr.msk.bf16.mxu1 %vm1057_vm9, %v4994_v48  ;;  %4356 = vmatprep.mubr.msk.bf16.mxu0 %vm1057_vm9, %v4994_v48 }
 0x188   : > { %4293 = vmatmul.mubr.msk.bf16.gmra.mrb[40].mxu1 %vm1057_vm9, %v4992_v35  ;;  %4357 = vmatmul.mubr.msk.bf16.gmra.mrb[28].mxu0 %vm1057_vm9, %v4992_v35 }
 0x1eb   : > { %v4118_v20 = vpop.f32.mrb[20].mxu1 }
 0x1ec   : > { %v1120_v41 = vpop.f32.mrb[21].mxu1 }
 0x1ed   : > { %v4119_v50 = vpop.f32.mrb[22].mxu1 }
 0x1ee   : > { %v1123_v31 = vpop.f32.mrb[23].mxu1  ;;  %v5338_v50 = vld [vmem:[%s5944_s6 + $0xa8] sm:$0xff]  }
 0x1fb   : > { %v4134_v52 = vpop.f32.mrb[24].mxu1 }
 0x1fc   : > { %v1229_v13 = vadd.f32 %v4134_v52, %v4118_v20  ;;  %v1220_v28 = vpop.f32.mrb[25].mxu1  ;;  %v2836_v52 = vunpack.c.h.bf16 %v5288_v14 }
 0x1fd   : > { %v1221_v33 = vadd.f32 %v1220_v28, %v1120_v41  ;;  %v4135_v58 = vpop.f32.mrb[26].mxu1 }
 0x1fe   : > { %v1223_v59 = vpop.f32.mrb[27].mxu1  ;;  %v5516_v58 = vld [vmem:[%s5944_s6 + $0x130] sm:$0xf] }
 0x1ff   : > { %v1224_v1 = vadd.f32 %v1223_v59, %v1123_v31  ;;  %v5353_v59 = vld [vmem:[%s5944_s6 + $0x10] sm:$0xff]  }
 0x20b   : > { %v4150_v18 = vpop.f32.mrb[28].mxu1 }
 0x20c   : > { %v1349_v4 = vadd.f32 %v4150_v18, %v1229_v13  ;;  %v1329_v48 = vpop.f32.mrb[29].mxu1  ;;  %v5359_v18 = vld [vmem:[%s5944_s6 + $0x80] sm:$0xff]  }
 0x20d   : > { %v1347_v22 = vadd.f32 %v1329_v48, %v1221_v33  ;;  %v4151_v46 = vpop.f32.mrb[30].mxu1  ;;  %v5347_v33 = vld [vmem:[%s5944_s6 + $0xb0] sm:$0xff]   ;;  %v5468_v48 = vld [vmem:[%s5944_s6 + $0x120] sm:$0xff]  }
 0x20e   : > { %v1332_v26 = vpop.f32.mrb[31].mxu1 }
 0x20f   : > { %v1348_v6 = vadd.f32 %v1332_v26, %v1224_v1 }
 0x213   : > { %v4162_v60 = vpop.f32.mrb[16].mxu1  ;;  %v4226_v35 = vpop.f32.mrb[16].mxu0 }
 0x214   : > { %v2681_v21 = vrot.slane %v4226_v35, 1  ;;  %v1429_v7 = vpop.f32.mrb[17].mxu1  ;;  %v1831_v23 = vpop.f32.mrb[17].mxu0  ;;  %v5375_v35 = vld [vmem:[%s5944_s6 + $0x58] sm:$0xff]  }
 0x215   : > { %v2679_v24 = vrot.slane %v1831_v23, 1  ;;  %v4163_v34 = vpop.f32.mrb[18].mxu1  ;;  %v4227_v29 = vpop.f32.mrb[18].mxu0 }
 0x216   : > { %v2682_v32 = vrot.slane %v4227_v29, 1  ;;  %v1432_v63 = vpop.f32.mrb[19].mxu1  ;;  %v1834_v12 = vpop.f32.mrb[19].mxu0  ;;  %v5266_v17 = vadd.f32 %v4162_v60, %v2681_v21  ;;  %v5475_v60 = vld [vmem:[%s5944_s6 + $0xf8] sm:$0xff]   ;;  %v5531_v21 = vld [vmem:[%s5944_s6 + $0xd0] sm:$0xff]  }
 0x217   : > { %v2680_v37 = vrot.slane %v1834_v12, 1  ;;  %v5268_v62 = vadd.f32 %v2679_v24, %v1429_v7  ;;  %v5392_v12 = vld [vmem:[%s5944_s6 + $0x50] sm:$0xff]   ;;  %v5481_v24 = vld [vmem:[%s5944_s6 + $0x98] sm:$0xff]  }
 0x218   : > { %v5270_v36 = vadd.f32 %v4163_v34, %v2682_v32  ;;  %v5386_v32 = vld [vmem:[%s5944_s6 + $0x88] sm:$0xff]  }
 0x219   : > { %v5272_v27 = vadd.f32 %v2680_v37, %v1432_v63  ;;  %v5499_v34 = vld [vmem:[%s5944_s6 + $0x128] sm:$0xff]  }
 0x21b   : > { %v4166_v19 = vpop.f32.mrb[32].mxu1  ;;  %v4230_v10 = vpop.f32.mrb[20].mxu0 }
 0x21c   : > { %v1465_v39 = vadd.f32 %v4166_v19, %v1349_v4  ;;  %v2685_v40 = vrot.slane %v4230_v10, 1  ;;  %v1445_v8 = vpop.f32.mrb[33].mxu1  ;;  %v1847_v43 = vpop.f32.mrb[21].mxu0  ;;  %v5398_v19 = vld [vmem:[%s5944_s6 + $0xb8] sm:$0xff]   ;;  %v5505_v4 = vld [vmem:[%s5943_s5] ss:$0 sm:$0xff] }
 0x21d   : > { %v1463_v44 = vadd.f32 %v1445_v8, %v1347_v22  ;;  %v2683_v30 = vrot.slane %v1847_v43, 1  ;;  %v4167_v42 = vpop.f32.mrb[34].mxu1  ;;  %v4231_v47 = vpop.f32.mrb[22].mxu0  ;;  %v5366_v22 = vld [vmem:[%s5944_s6 + $0x48] sm:$0xff]   ;;  %v5436_v8 = vld [vmem:[%s5944_s6 + $0x90] sm:$0xff]  }
 0x21e   : > { %v1448_v61 = vpop.f32.mrb[35].mxu1  ;;  %v1850_v16 = vpop.f32.mrb[23].mxu0  ;;  %v5274_v25 = vadd.f32 %v2685_v40, %v1465_v39  ;;  %v5407_v43 = vld [vmem:[%s5944_s6 + $0x68] sm:$0xff]   ;;  %v5463_v47 = vld [vmem:[%s5944_s6 + $0xa0] sm:$0xff]  }
 0x21f   : > { %v1464_v49 = vadd.f32 %v1448_v61, %v1348_v6  ;;  %v2684_v2 = vrot.slane %v1850_v16, 1  ;;  %v5276_v53 = vadd.f32 %v2683_v30, %v1463_v44  ;;  %v5412_v44 = vld [vmem:[%s5944_s6 + $0xe0] sm:$0xff]   ;;  %v5417_v30 = vld [vmem:[%s5944_s6 + $0xe8] sm:$0xff]   ;;  %v5454_v61 = vld [vmem:[%s5944_s6 + $0x118] sm:$0xff]  }
 0x220   : > { %v5425_v16 = vld [vmem:[%s5944_s6 + $0xc0] sm:$0xff]   ;;  %v5487_v40 = vld [vmem:[%s5944_s6 + $0xc8] sm:$0xff]  }
 0x221   : > { %v5278_v55 = vadd.f32 %v2684_v2, %v1464_v49  ;;  %v5431_v2 = vld [vmem:[%s5944_s6 + $0x60] sm:$0xff]   ;;  %v5445_v49 = vld [vmem:[%s5944_s6 + $0xf0] sm:$0xff]  }
 0x253   : > { %v4290_v37 = vpop.f32.mrb[36].mxu1  ;;  %v4354_v6 = vpop.f32.mrb[24].mxu0 }
 0x254   : > { %v2701_v23 = vadd.f32 %v4290_v37, %v5272_v27  ;;  %v2715_v10 = vrot.slane %v4354_v6, 1  ;;  %v2233_v1 = vpop.f32.mrb[37].mxu1  ;;  %v2635_v63 = vpop.f32.mrb[25].mxu0  ;;  %v5521_v6 = vld [vmem:[%s5944_s6 + $0x100] sm:$0xff]  }
 0x255   : > { %v4291_v42 = vpop.f32.mrb[38].mxu1  ;;  %v4355_v27 = vpop.f32.mrb[26].mxu0 }
 0x256   : > { %v2729_v26 = vadd.f32 %v2715_v10, %v2701_v23  ;;  %v2702_v28 = vadd.f32 %v4291_v42, %v5266_v17  ;;  %v2716_v29 = vrot.slane %v4355_v27, 1  ;;  %v2235_v39 = vpop.f32.mrb[39].mxu1  ;;  %v2637_v7 = vpop.f32.mrb[27].mxu0 }
 0x257   : > { %v2700_v23 = vadd.f32 %v5268_v62, %v2235_v39  ;;  %v2714_v10 = vrot.slane %v2637_v7, 1  ;;  %v5536_v62 = vld [vmem:[%s5944_s6 + $0xd8] sm:$0xff]  }
 0x258   : > { %v2743_v27 = vadd.f32 %v5505_v4, %v2729_v26  ;;  %v2730_v37 = vadd.f32 %v2716_v29, %v2702_v28 }
 0x259   : > { %v2728_v39 = vadd.f32 %v2714_v10, %v2700_v23 }
 0x25a   : > { %vm2750_vm3 = vcmp.ge.f32.partialorder %v2743_v27, 0.0  ;;  %v2757_v29 = vmul.f32 0.2, %v2743_v27  ;;  %v2744_v17 = vadd.f32 %v5505_v4, %v2730_v37 }
 0x25b   : > { %v2742_v23 = vadd.f32 %v5505_v4, %v2728_v39  ;;  %v4294_v10 = vpop.f32.mrb[40].mxu1  ;;  %v4358_v42 = vpop.f32.mrb[28].mxu0 }
 0x25c   : > { %v5555_v1 = vsel %vm2750_vm3, %v2743_v27, %v2757_v29  ;;  %vm2751_vm4 = vcmp.ge.f32.partialorder %v2744_v17, 0.0  ;;  %v2758_v20 = vmul.f32 0.2, %v2744_v17  ;;  %v2705_v13 = vadd.f32 %v4294_v10, %v5278_v55  ;;  %v2248_v37 = vpop.f32.mrb[41].mxu1  ;;  %v2650_v31 = vpop.f32.mrb[29].mxu0 }
 0x25d   : > { %2771 = vst [vmem:[%s5547_s25 + $0x8] sm:$0x7f] %v5555_v1  ;;  %vm2749_vm5 = vcmp.ge.f32.partialorder %v2742_v23, 0.0  ;;  %v2756_v39 = vmul.f32 0.2, %v2742_v23  ;;  %v2719_v7 = vrot.slane %v4358_v42, 1  ;;  %v2703_v26 = vadd.f32 %v5270_v36, %v2248_v37 }
 0x25e   : > { %v4295_v28 = vpop.f32.mrb[42].mxu1  ;;  %v4359_v54 = vpop.f32.mrb[30].mxu0  ;;  %v5561_v63 = vsel %vm2751_vm4, %v2744_v17, %v2758_v20  ;;  %v2717_v27 = vrot.slane %v2650_v31, 1 }
 0x25f   : > { %v2706_v29 = vadd.f32 %v4295_v28, %v5274_v25  ;;  %v2720_v41 = vrot.slane %v4359_v54, 1  ;;  %v2251_v55 = vpop.f32.mrb[43].mxu1  ;;  %v2653_v10 = vpop.f32.mrb[31].mxu0  ;;  %2772 = vst [vmem:[%s5547_s25 + $0x10] sm:$0x7f] %v5561_v63  ;;  %v5566_v46 = vsel %vm2749_vm5, %v2742_v23, %v2756_v39  ;;  %v2733_v38 = vadd.f32 %v2719_v7, %v2705_v13 }
 0x260   : > { %v2704_v15 = vadd.f32 %v5276_v53, %v2251_v55  ;;  %v2718_v42 = vrot.slane %v2653_v10, 1  ;;  %2770 = vst [vmem:[%s5547_s25] sm:$0x7f] %v5566_v46  ;;  %v2731_v36 = vadd.f32 %v2717_v27, %v2703_v26  ;;  %v2843_v20 = vmul.f32 %v2836_v52, %v5566_v46 }
 0x261   : > { %v2734_v37 = vadd.f32 %v2720_v41, %v2706_v29  ;;  %v5948_v25 = vunpack.c.l.bf16 %v5283_v57  ;;  %v2747_v31 = vadd.f32 %v5505_v4, %v2733_v38  ;;  %v5949_v13 = vunpack.c.h.bf16 %v5283_v57 }
 0x262   : > { %v2732_v17 = vadd.f32 %v2718_v42, %v2704_v15  ;;  %v5950_v7 = vunpack.c.l.bf16 %v5303_v9  ;;  %v2745_v41 = vadd.f32 %v5505_v4, %v2731_v36  ;;  %v2850_v28 = vsel %vm2801_vm2, %v2843_v20, 0.0 }
 0x263   : > { %v2844_v54 = vmul.f32 %v5948_v25, %v5555_v1  ;;  %v2845_v53 = vmul.f32 %v5949_v13, %v5561_v63  ;;  %v2748_v52 = vadd.f32 %v5505_v4, %v2734_v37  ;;  %vm2754_vm6 = vcmp.ge.f32.partialorder %v2747_v31, 0.0  ;;  %v5604_v25 = vld [vmem:[%s5944_s6 + $0x108] sm:$0xff]  }
 0x264   : > { %v2794_v26 = vmul.f32 %v5950_v7, %v5566_v46  ;;  %v2761_v38 = vmul.f32 0.2, %v2747_v31  ;;  %v2746_v15 = vadd.f32 %v5505_v4, %v2732_v17  ;;  %vm2752_vm7 = vcmp.ge.f32.partialorder %v2745_v41, 0.0 }
 0x265   : > { %v2851_v23 = vsel %vm2801_vm2, %v2844_v54, 0.0  ;;  %v2759_v57 = vmul.f32 0.2, %v2745_v41  ;;  %vm2755_vm8 = vcmp.ge.f32.partialorder %v2748_v52, 0.0  ;;  %v2762_v27 = vmul.f32 0.2, %v2748_v52 }
 0x266   : > { %v2852_v39 = vadd.f32 %v2851_v23, %v2850_v28  ;;  %v5589_v29 = vsel %vm2754_vm6, %v2747_v31, %v2761_v38  ;;  %vm2753_vm9 = vcmp.ge.f32.partialorder %v2746_v15, 0.0  ;;  %v2760_v55 = vmul.f32 0.2, %v2746_v15  ;;  %v5609_v54 = vld [vmem:[%s5944_s6 + $0x110] sm:$0xff]  }
 0x267   : > { %v2853_v10 = vsel %vm2801_vm2, %v2845_v53, 0.0  ;;  %2775 = vst [vmem:[%s5547_s25 + $0x28] sm:$0x7f] %v5589_v29  ;;  %v5594_v42 = vsel %vm2752_vm7, %v2745_v41, %v2759_v57  ;;  %v5596_v36 = vsel %vm2755_vm8, %v2748_v52, %v2762_v27  ;;  %v5951_v4 = vunpack.c.l.bf16 %v5298_v56 }
 0x268   : > { %v2854_v20 = vadd.f32 %v2853_v10, %v2852_v39  ;;  %2773 = vst [vmem:[%s5547_s25 + $0x18] sm:$0x7f] %v5594_v42  ;;  %2776 = vst [vmem:[%s5547_s25 + $0x30] sm:$0x7f] %v5596_v36  ;;  %v5615_v31 = vsel %vm2753_vm9, %v2746_v15, %v2760_v55  ;;  %v5952_v17 = vunpack.c.l.bf16 %v5293_v5  ;;  %v5953_v53 = vunpack.c.h.bf16 %v5298_v56 }
 0x269   : > { %v2848_v37 = vmul.f32 %v5951_v4, %v5589_v29  ;;  %v5954_v41 = vunpack.c.h.bf16 %v5303_v9  ;;  %2774 = vst [vmem:[%s5547_s25 + $0x20] sm:$0x7f] %v5615_v31  ;;  %v5955_v28 = vunpack.c.h.bf16 %v5293_v5  ;;  %v5956_v38 = vunpack.c.l.bf16 %v5319_v3 }
 0x26a   : > { %v2846_v13 = vmul.f32 %v5952_v17, %v5594_v42  ;;  %v2849_v7 = vmul.f32 %v5953_v53, %v5596_v36  ;;  %v5957_v39 = vunpack.c.h.bf16 %v5319_v3  ;;  %v3852_v9 = vunpack.c.h.bf16 %v5531_v21 }
 0x26b   : > { %v2795_v52 = vmul.f32 %v5954_v41, %v5555_v1  ;;  %v2847_v23 = vmul.f32 %v5955_v28, %v5615_v31  ;;  %v2796_v15 = vmul.f32 %v5956_v38, %v5561_v63  ;;  %v3875_v55 = vunpack.c.l.bf16 %v5604_v25 }
 0x26c   : > { %v2797_v57 = vmul.f32 %v5957_v39, %v5594_v42  ;;  %v2855_v27 = vsel %vm2801_vm2, %v2846_v13, 0.0  ;;  %v5958_v17 = vunpack.c.l.bf16 %v5353_v59  ;;  %v2802_v3 = vsel %vm2801_vm2, %v2794_v26, 0.0 }
 0x26d   : > { %v2856_v5 = vadd.f32 %v2855_v27, %v2854_v20  ;;  %v2857_v4 = vsel %vm2801_vm2, %v2847_v23, 0.0  ;;  %v2859_v41 = vsel %vm2801_vm2, %v2848_v37, 0.0  ;;  %v2861_v28 = vsel %vm2801_vm2, %v2849_v7, 0.0 }
 0x26e   : > { %v2798_v53 = vmul.f32 %v5958_v17, %v5615_v31  ;;  %v5959_v13 = vunpack.c.h.bf16 %v5353_v59  ;;  %v2803_v39 = vsel %vm2801_vm2, %v2795_v52, 0.0  ;;  %v2805_v23 = vsel %vm2801_vm2, %v2796_v15, 0.0 }
 0x26f   : > { %v2858_v10 = vadd.f32 %v2857_v4, %v2856_v5  ;;  %v2804_v20 = vadd.f32 %v2803_v39, %v2802_v3  ;;  %v2807_v27 = vsel %vm2801_vm2, %v2797_v57, 0.0  ;;  %v5960_v17 = vunpack.c.l.bf16 %v5308_v0 }
 0x270   : > { %v2799_v38 = vmul.f32 %v5959_v13, %v5589_v29  ;;  %v5961_v37 = vunpack.c.h.bf16 %v5308_v0  ;;  %v5962_v59 = vunpack.c.l.bf16 %v5324_v11  ;;  %v5963_v52 = vunpack.c.h.bf16 %v5324_v11 }
 0x271   : > { %v2987_v26 = vmul.f32 %v5960_v17, %v5566_v46  ;;  %v2860_v4 = vadd.f32 %v2859_v41, %v2858_v10  ;;  %v5964_v15 = vunpack.c.l.bf16 %v5288_v14  ;;  %v2806_v3 = vadd.f32 %v2805_v23, %v2804_v20 }
 0x272   : > { %v2988_v7 = vmul.f32 %v5961_v37, %v5555_v1  ;;  %v2989_v13 = vmul.f32 %v5962_v59, %v5561_v63  ;;  %v2990_v5 = vmul.f32 %v5963_v52, %v5594_v42  ;;  %v2809_v39 = vsel %vm2801_vm2, %v2798_v53, 0.0 }
 0x273   : > { %v2800_v57 = vmul.f32 %v5964_v15, %v5596_v36  ;;  %v2811_v17 = vsel %vm2801_vm2, %v2799_v38, 0.0  ;;  %v5965_v0 = vunpack.c.l.bf16 %v5359_v18  ;;  %v2994_v59 = vsel %vm2801_vm2, %v2987_v26, 0.0 }
 0x274   : > { %v2995_v56 = vsel %vm2801_vm2, %v2988_v7, 0.0  ;;  %v2862_v11 = vadd.f32 %v2861_v28, %v2860_v4  ;;  %v2808_v52 = vadd.f32 %v2807_v27, %v2806_v3  ;;  %v5966_v10 = vunpack.c.h.bf16 %v5359_v18 }
 0x275   : > { %v2991_v37 = vmul.f32 %v5965_v0, %v5615_v31  ;;  %v2996_v41 = vadd.f32 %v2995_v56, %v2994_v59  ;;  %v5967_v53 = vunpack.c.l.bf16 %v5386_v32  ;;  %v2997_v38 = vsel %vm2801_vm2, %v2989_v13, 0.0 }
 0x276   : > { %v2992_v14 = vmul.f32 %v5966_v10, %v5589_v29  ;;  %v2999_v23 = vsel %vm2801_vm2, %v2990_v5, 0.0  ;;  %v5968_v26 = vunpack.c.l.bf16 %v5313_v45  ;;  %2863 = vadd.xlane.f32.xlu1 %v2862_v11  ;;  %v2810_v28 = vadd.f32 %v2809_v39, %v2808_v52 }
 0x277   : > { %v2993_v20 = vmul.f32 %v5967_v53, %v5596_v36  ;;  %v2998_v27 = vadd.f32 %v2997_v38, %v2996_v41  ;;  %v5969_v18 = vunpack.c.h.bf16 %v5313_v45  ;;  %v5970_v56 = vunpack.c.l.bf16 %v5329_v51 }
 0x278   : > { %v2891_v15 = vmul.f32 %v5968_v26, %v5566_v46  ;;  %v2813_v3 = vsel %vm2801_vm2, %v2800_v57, 0.0  ;;  %v3001_v13 = vsel %vm2801_vm2, %v2991_v37, 0.0  ;;  %v5971_v5 = vunpack.c.h.bf16 %v5329_v51 }
 0x279   : > { %v2892_v7 = vmul.f32 %v5969_v18, %v5555_v1  ;;  %v2893_v4 = vmul.f32 %v5970_v56, %v5561_v63  ;;  %v5972_v39 = vunpack.c.l.bf16 %v5366_v22  ;;  %v2812_v11 = vadd.f32 %v2811_v17, %v2810_v28 }
 0x27a   : > { %v2894_v0 = vmul.f32 %v5971_v5, %v5594_v42  ;;  %v3000_v52 = vadd.f32 %v2999_v23, %v2998_v27  ;;  %v2898_v45 = vsel %vm2801_vm2, %v2891_v15, 0.0  ;;  %v3003_v41 = vsel %vm2801_vm2, %v2992_v14, 0.0 }
 0x27b   : > { %v2895_v59 = vmul.f32 %v5972_v39, %v5615_v31  ;;  %v2899_v10 = vsel %vm2801_vm2, %v2892_v7, 0.0  ;;  %v3005_v57 = vsel %vm2801_vm2, %v2993_v20, 0.0  ;;  %v5973_v37 = vunpack.c.h.bf16 %v5366_v22 }
 0x27c   : > { %v2900_v51 = vadd.f32 %v2899_v10, %v2898_v45  ;;  %v2814_v38 = vadd.f32 %v2813_v3, %v2812_v11  ;;  %v3002_v26 = vadd.f32 %v3001_v13, %v3000_v52  ;;  %v2901_v18 = vsel %vm2801_vm2, %v2893_v4, 0.0 }
 0x27d   : > { %v2896_v53 = vmul.f32 %v5973_v37, %v5589_v29  ;;  %v2903_v17 = vsel %vm2801_vm2, %v2894_v0, 0.0  ;;  %v5974_v15 = vunpack.c.l.bf16 %v5338_v50  ;;  %v5975_v14 = vunpack.c.h.bf16 %v5338_v50 }
 0x27e   : > { %v2902_v23 = vadd.f32 %v2901_v18, %v2900_v51  ;;  %v5976_v22 = vunpack.c.l.bf16 %v5347_v33  ;;  %2815 = vadd.xlane.f32.xlu0 %v2814_v38  ;;  %v3004_v7 = vadd.f32 %v3003_v41, %v3002_v26  ;;  %v5977_v56 = vunpack.c.l.bf16 %v5392_v12 }
 0x27f   : > { %v3083_v28 = vmul.f32 %v5974_v15, %v5566_v46  ;;  %v3084_v20 = vmul.f32 %v5975_v14, %v5555_v1  ;;  %v2905_v3 = vsel %vm2801_vm2, %v2895_v59, 0.0  ;;  %v5978_v13 = vunpack.c.h.bf16 %v5347_v33 }
 0x280   : > { %v3085_v27 = vmul.f32 %v5976_v22, %v5561_v63  ;;  %v2897_v4 = vmul.f32 %v5977_v56, %v5596_v36  ;;  %v2904_v0 = vadd.f32 %v2903_v17, %v2902_v23  ;;  %v5979_v50 = vunpack.c.l.bf16 %v5398_v19 }
 0x281   : > { %v3086_v5 = vmul.f32 %v5978_v13, %v5594_v42  ;;  %v3090_v11 = vsel %vm2801_vm2, %v3083_v28, 0.0  ;;  %v3091_v52 = vsel %vm2801_vm2, %v3084_v20, 0.0  ;;  %v3006_v45 = vadd.f32 %v3005_v57, %v3004_v7 }
 0x282   : > { %v3087_v39 = vmul.f32 %v5979_v50, %v5615_v31  ;;  %v2907_v10 = vsel %vm2801_vm2, %v2896_v53, 0.0  ;;  %v5980_v41 = vunpack.c.h.bf16 %v5398_v19  ;;  %v3092_v37 = vadd.f32 %v3091_v52, %v3090_v11 }
 0x283   : > { %v2906_v51 = vadd.f32 %v2905_v3, %v2904_v0  ;;  %v5981_v33 = vunpack.c.l.bf16 %v5425_v16  ;;  %v3093_v26 = vsel %vm2801_vm2, %v3085_v27, 0.0  ;;  %v3095_v18 = vsel %vm2801_vm2, %v3086_v5, 0.0  ;;  %3007 = vadd.xlane.f32.xlu1 %v3006_v45 }
 0x284   : > { %v3088_v59 = vmul.f32 %v5980_v41, %v5589_v29  ;;  %v3094_v17 = vadd.f32 %v3093_v26, %v3092_v37  ;;  %v5982_v57 = vunpack.c.h.bf16 %v5392_v12  ;;  %v5983_v19 = vunpack.c.l.bf16 %v5375_v35 }
 0x285   : > { %v3089_v38 = vmul.f32 %v5981_v33, %v5596_v36  ;;  %v5984_v15 = vunpack.c.h.bf16 %v5375_v35  ;;  %v2908_v14 = vadd.f32 %v2907_v10, %v2906_v51  ;;  %v2909_v20 = vsel %vm2801_vm2, %v2897_v4, 0.0 }
 0x286   : > { %v2939_v53 = vmul.f32 %v5982_v57, %v5566_v46  ;;  %v2940_v23 = vmul.f32 %v5983_v19, %v5555_v1  ;;  %v3097_v22 = vsel %vm2801_vm2, %v3087_v39, 0.0  ;;  %v5985_v27 = vunpack.c.l.bf16 %v5431_v2 }
 0x287   : > { %v2941_v28 = vmul.f32 %v5984_v15, %v5561_v63  ;;  %v3096_v56 = vadd.f32 %v3095_v18, %v3094_v17  ;;  %v5986_v12 = vunpack.c.h.bf16 %v5431_v2  ;;  %v2910_v35 = vadd.f32 %v2909_v20, %v2908_v14 }
 0x288   : > { %v2942_v7 = vmul.f32 %v5985_v27, %v5594_v42  ;;  %v2946_v13 = vsel %vm2801_vm2, %v2939_v53, 0.0  ;;  %v2947_v5 = vsel %vm2801_vm2, %v2940_v23, 0.0  ;;  %v3099_v0 = vsel %vm2801_vm2, %v3088_v59, 0.0 }
 0x289   : > { %v2943_v3 = vmul.f32 %v5986_v12, %v5615_v31  ;;  %v3101_v4 = vsel %vm2801_vm2, %v3089_v38, 0.0  ;;  %v2948_v50 = vadd.f32 %v2947_v5, %v2946_v13  ;;  %v3098_v39 = vadd.f32 %v3097_v22, %v3096_v56  ;;  %2911 = vadd.xlane.f32.xlu0 %v2910_v35 }
 0x28a   : > { %v5987_v11 = vunpack.c.l.bf16 %v5407_v43  ;;  %v2949_v45 = vsel %vm2801_vm2, %v2941_v28, 0.0  ;;  %v2951_v2 = vsel %vm2801_vm2, %v2942_v7, 0.0  ;;  %v5988_v41 = vunpack.c.l.bf16 %v5412_v44 }
 0x28b   : > { %v2950_v10 = vadd.f32 %v2949_v45, %v2948_v50  ;;  %v5989_v59 = vunpack.c.h.bf16 %v5412_v44  ;;  %v5990_v33 = vunpack.c.l.bf16 %v5417_v30  ;;  %v3100_v26 = vadd.f32 %v3099_v0, %v3098_v39 }
 0x28c   : > { %v2944_v52 = vmul.f32 %v5987_v11, %v5589_v29  ;;  %v3179_v37 = vmul.f32 %v5988_v41, %v5566_v46  ;;  %v5991_v18 = vunpack.c.h.bf16 %v5407_v43  ;;  %v2953_v57 = vsel %vm2801_vm2, %v2943_v3, 0.0 }
 0x28d   : > { %v3180_v51 = vmul.f32 %v5989_v59, %v5555_v1  ;;  %v3181_v38 = vmul.f32 %v5990_v33, %v5561_v63  ;;  %v5992_v53 = vunpack.c.h.bf16 %v5417_v30  ;;  %v2952_v23 = vadd.f32 %v2951_v2, %v2950_v10 }
 0x28e   : > { %v2945_v17 = vmul.f32 %v5991_v18, %v5596_v36  ;;  %v5993_v44 = vunpack.c.l.bf16 %v5445_v49  ;;  %v3186_v28 = vsel %vm2801_vm2, %v3179_v37, 0.0  ;;  %v3102_v20 = vadd.f32 %v3101_v4, %v3100_v26 }
 0x28f   : > { %v3182_v19 = vmul.f32 %v5992_v53, %v5594_v42  ;;  %v3187_v14 = vsel %vm2801_vm2, %v3180_v51, 0.0  ;;  %v2955_v22 = vsel %vm2801_vm2, %v2944_v52, 0.0  ;;  %v5994_v43 = vunpack.c.h.bf16 %v5445_v49 }
 0x290   : > { %v3183_v15 = vmul.f32 %v5993_v44, %v5615_v31  ;;  %v3188_v7 = vadd.f32 %v3187_v14, %v3186_v28  ;;  %v2954_v56 = vadd.f32 %v2953_v57, %v2952_v23  ;;  %v5995_v30 = vunpack.c.l.bf16 %v5475_v60  ;;  %3103 = vadd.xlane.f32.xlu1 %v3102_v20 }
 0x291   : > { %v3184_v27 = vmul.f32 %v5994_v43, %v5589_v29  ;;  %v3189_v3 = vsel %vm2801_vm2, %v3181_v38, 0.0  ;;  %v3191_v13 = vsel %vm2801_vm2, %v3182_v19, 0.0  ;;  %v5996_v35 = vunpack.c.h.bf16 %v5386_v32 }
 0x292   : > { %v3185_v12 = vmul.f32 %v5995_v30, %v5596_v36  ;;  %v3190_v5 = vadd.f32 %v3189_v3, %v3188_v7  ;;  %v5997_v49 = vunpack.c.l.bf16 %v5436_v8  ;;  %v5998_v50 = vunpack.c.h.bf16 %v5436_v8 }
 0x293   : > { %v3035_v0 = vmul.f32 %v5996_v35, %v5566_v46  ;;  %v2956_v11 = vadd.f32 %v2955_v22, %v2954_v56  ;;  %v2957_v52 = vsel %vm2801_vm2, %v2945_v17, 0.0  ;;  %v3193_v45 = vsel %vm2801_vm2, %v3183_v15, 0.0 }
 0x294   : > { %v3036_v4 = vmul.f32 %v5997_v49, %v5555_v1  ;;  %v3037_v39 = vmul.f32 %v5998_v50, %v5561_v63  ;;  %v5999_v2 = vunpack.c.l.bf16 %v5481_v24  ;;  %v3192_v41 = vadd.f32 %v3191_v13, %v3190_v5 }
 0x295   : > { %v6000_v32 = vunpack.c.h.bf16 %v5481_v24  ;;  %v3042_v59 = vsel %vm2801_vm2, %v3035_v0, 0.0  ;;  %v2958_v8 = vadd.f32 %v2957_v52, %v2956_v11  ;;  %v3195_v33 = vsel %vm2801_vm2, %v3184_v27, 0.0 }
 0x296   : > { %v3038_v10 = vmul.f32 %v5999_v2, %v5594_v42  ;;  %v3043_v51 = vsel %vm2801_vm2, %v3036_v4, 0.0  ;;  %v3197_v38 = vsel %vm2801_vm2, %v3185_v12, 0.0  ;;  %v3194_v18 = vadd.f32 %v3193_v45, %v3192_v41 }
 0x297   : > { %v3039_v37 = vmul.f32 %v6000_v32, %v5615_v31  ;;  %v3044_v26 = vadd.f32 %v3043_v51, %v3042_v59  ;;  %v6001_v17 = vunpack.c.l.bf16 %v5463_v47  ;;  %v3045_v53 = vsel %vm2801_vm2, %v3037_v39, 0.0  ;;  %2959 = vadd.xlane.f32.xlu0 %v2958_v8 }
 0x298   : > { %v3047_v24 = vsel %vm2801_vm2, %v3038_v10, 0.0  ;;  %v6002_v23 = vunpack.c.l.bf16 %v5454_v61  ;;  %v6003_v15 = vunpack.c.h.bf16 %v5454_v61  ;;  %v6004_v14 = vunpack.c.l.bf16 %v5468_v48 }
 0x299   : > { %v3040_v57 = vmul.f32 %v6001_v17, %v5589_v29  ;;  %v3046_v19 = vadd.f32 %v3045_v53, %v3044_v26  ;;  %v3196_v22 = vadd.f32 %v3195_v33, %v3194_v18  ;;  %v6005_v43 = vunpack.c.h.bf16 %v5463_v47 }
 0x29a   : > { %v3275_v44 = vmul.f32 %v6002_v23, %v5566_v46  ;;  %v3276_v28 = vmul.f32 %v6003_v15, %v5555_v1  ;;  %v3277_v20 = vmul.f32 %v6004_v14, %v5561_v63  ;;  %v3049_v7 = vsel %vm2801_vm2, %v3039_v37, 0.0 }
 0x29b   : > { %v3041_v27 = vmul.f32 %v6005_v43, %v5596_v36  ;;  %v6006_v56 = vunpack.c.h.bf16 %v5468_v48  ;;  %v3048_v12 = vadd.f32 %v3047_v24, %v3046_v19  ;;  %v6007_v61 = vunpack.c.l.bf16 %v5499_v34 }
 0x29c   : > { %v3282_v13 = vsel %vm2801_vm2, %v3275_v44, 0.0  ;;  %v3283_v5 = vsel %vm2801_vm2, %v3276_v28, 0.0  ;;  %v3198_v35 = vadd.f32 %v3197_v38, %v3196_v22  ;;  %v3051_v0 = vsel %vm2801_vm2, %v3040_v57, 0.0 }
 0x29d   : > { %v3278_v30 = vmul.f32 %v6006_v56, %v5594_v42  ;;  %v3279_v3 = vmul.f32 %v6007_v61, %v5615_v31  ;;  %v6008_v47 = vunpack.c.h.bf16 %v5499_v34  ;;  %v3284_v4 = vadd.f32 %v3283_v5, %v3282_v13 }
 0x29e   : > { %v3050_v50 = vadd.f32 %v3049_v7, %v3048_v12  ;;  %v6009_v48 = vunpack.c.l.bf16 %v5516_v58  ;;  %v3285_v11 = vsel %vm2801_vm2, %v3277_v20, 0.0  ;;  %3199 = vadd.xlane.f32.xlu1 %v3198_v35  ;;  %v6010_v2 = vunpack.c.h.bf16 %v5425_v16 }
 0x29f   : > { %v3280_v49 = vmul.f32 %v6008_v47, %v5589_v29  ;;  %v3287_v52 = vsel %vm2801_vm2, %v3278_v30, 0.0  ;;  %v3286_v45 = vadd.f32 %v3285_v11, %v3284_v4  ;;  %v6011_v34 = vunpack.c.l.bf16 %v5487_v40 }
 0x2a0   : > { %v3281_v39 = vmul.f32 %v6009_v48, %v5596_v36  ;;  %v3131_v10 = vmul.f32 %v6010_v2, %v5566_v46  ;;  %v6012_v32 = vunpack.c.h.bf16 %v5487_v40  ;;  %v3052_v58 = vadd.f32 %v3051_v0, %v3050_v50 }
 0x2a1   : > { %v3132_v41 = vmul.f32 %v6011_v34, %v5555_v1  ;;  %v3053_v59 = vsel %vm2801_vm2, %v3041_v27, 0.0  ;;  %v3289_v51 = vsel %vm2801_vm2, %v3279_v3, 0.0  ;;  %v6013_v8 = vunpack.c.l.bf16 %v5531_v21 }
 0x2a2   : > { %v3133_v37 = vmul.f32 %v6012_v32, %v5561_v63  ;;  %v3288_v38 = vadd.f32 %v3287_v52, %v3286_v45  ;;  %v3135_v16 = vmul.f32 %v3852_v9, %v5615_v31  ;;  %v3138_v26 = vsel %vm2801_vm2, %v3131_v10, 0.0 }
 0x2a3   : > { %v3134_v33 = vmul.f32 %v6013_v8, %v5594_v42  ;;  %v3139_v18 = vsel %vm2801_vm2, %v3132_v41, 0.0  ;;  %v3054_v40 = vadd.f32 %v3053_v59, %v3052_v58  ;;  %v3291_v17 = vsel %vm2801_vm2, %v3280_v49, 0.0 }
 0x2a4   : > { %v3140_v57 = vadd.f32 %v3139_v18, %v3138_v26  ;;  %v3876_v53 = vunpack.c.h.bf16 %v5604_v25  ;;  %v3290_v24 = vadd.f32 %v3289_v51, %v3288_v38  ;;  %v3293_v19 = vsel %vm2801_vm2, %v3281_v39, 0.0 }
 0x2a5   : > { %v3141_v23 = vsel %vm2801_vm2, %v3133_v37, 0.0  ;;  %v3143_v44 = vsel %vm2801_vm2, %v3134_v33, 0.0  ;;  %3055 = vadd.xlane.f32.xlu0 %v3054_v40  ;;  %v6014_v9 = vunpack.c.h.bf16 %v5475_v60  ;;  %v6015_v28 = vunpack.c.l.bf16 %v5521_v6 }
 0x2a6   : > { %v3142_v21 = vadd.f32 %v3141_v23, %v3140_v57  ;;  %v6016_v20 = vunpack.c.h.bf16 %v5521_v6  ;;  %v3292_v43 = vadd.f32 %v3291_v17, %v3290_v24  ;;  %v6017_v27 = vunpack.c.l.bf16 %v5536_v62 }
 0x2a7   : > { %v3227_v15 = vmul.f32 %v6014_v9, %v5566_v46  ;;  %v3228_v14 = vmul.f32 %v6015_v28, %v5555_v1  ;;  %v3145_v56 = vsel %vm2801_vm2, %v3135_v16, 0.0  ;;  %v3230_v60 = vmul.f32 %v3875_v55, %v5594_v42 }
 0x2a8   : > { %v3229_v22 = vmul.f32 %v6016_v20, %v5561_v63  ;;  %v3136_v7 = vmul.f32 %v6017_v27, %v5589_v29  ;;  %v3144_v46 = vadd.f32 %v3143_v44, %v3142_v21  ;;  %v3231_v30 = vmul.f32 %v3876_v53, %v5615_v31 }
 0x2a9   : > { %v3234_v1 = vsel %vm2801_vm2, %v3227_v15, 0.0  ;;  %v3235_v12 = vsel %vm2801_vm2, %v3228_v14, 0.0  ;;  %v3294_v6 = vadd.f32 %v3293_v19, %v3292_v43  ;;  %v6018_v63 = vunpack.c.h.bf16 %v5536_v62 }
 0x2aa   : > { %v3236_v3 = vadd.f32 %v3235_v12, %v3234_v1  ;;  %v3146_v13 = vadd.f32 %v3145_v56, %v3144_v46  ;;  %v3880_v5 = vunpack.c.h.bf16 %v5609_v54  ;;  %v3237_v35 = vsel %vm2801_vm2, %v3229_v22, 0.0 }
 0x2ab   : > { %v3137_v61 = vmul.f32 %v6018_v63, %v5596_v36  ;;  %v3239_v42 = vsel %vm2801_vm2, %v3230_v60, 0.0  ;;  %3295 = vadd.xlane.f32.xlu1 %v3294_v6  ;;  %v3147_v25 = vsel %vm2801_vm2, %v3136_v7, 0.0  ;;  %v6019_v0 = vunpack.c.l.bf16 %v5609_v54 }
 0x2ac   : > { %v3238_v31 = vadd.f32 %v3237_v35, %v3236_v3  ;;  %v3148_v55 = vadd.f32 %v3147_v25, %v3146_v13  ;;  %v3241_v62 = vsel %vm2801_vm2, %v3231_v30, 0.0  ;;  %v3233_v48 = vmul.f32 %v3880_v5, %v5596_v36 }
 0x2ad   : > { %v3232_v47 = vmul.f32 %v6019_v0, %v5589_v29  ;;  %v3149_v49 = vsel %vm2801_vm2, %v3137_v61, 0.0  ;;  %vm3315_vm5 = vcmask 122880  }
 0x2ae   : > { %v3240_v4 = vadd.f32 %v3239_v42, %v3238_v31  ;;  %v3150_v50 = vadd.f32 %v3149_v49, %v3148_v55  ;;  %v3245_v45 = vsel %vm2801_vm2, %v3233_v48, 0.0 }
 0x2af   : > { %v3243_v11 = vsel %vm2801_vm2, %v3232_v47, 0.0 }
 0x2b0   : > { %v3242_v39 = vadd.f32 %v3241_v62, %v3240_v4  ;;  %3151 = vadd.xlane.f32.xlu0 %v3150_v50 }
 0x2b2   : > { %v3244_v52 = vadd.f32 %v3243_v11, %v3242_v39 }
 0x2b4   : > { %v3246_v2 = vadd.f32 %v3245_v45, %v3244_v52 }
 0x2b6   : > { %3247 = vadd.xlane.f32.xlu0 %v3246_v2 }
 0x303   : > { %v2864_v10 = vpop.xlane.xlu1 %2863 }
 0x304   : > { %v2865_v54 = vrot.slane %v2864_v10, 4 }
 0x306   : > { %v2866_v29 = vadd.f32 %v2865_v54, %v2864_v10 }
 0x308   : > { %v2867_v34 = vrot.slane %v2866_v29, 2 }
 0x30a   : > { %v2868_v37 = vadd.f32 %v2867_v34, %v2866_v29 }
 0x30b   : > { %v2816_v41 = vpop.xlane.xlu0 %2815 }
 0x30c   : > { %v2817_v32 = vrot.slane %v2816_v41, 4  ;;  %v2869_v51 = vrot.slane %v2868_v37, 1 }
 0x30e   : > { %v2818_v58 = vadd.f32 %v2817_v32, %v2816_v41  ;;  %v2870_v26 = vadd.f32 %v2869_v51, %v2868_v37 }
 0x310   : > { %v2819_v59 = vrot.slane %v2818_v58, 2  ;;  %v3008_v8 = vpop.xlane.xlu1 %3007 }
 0x311   : > { %v3009_v18 = vrot.slane %v3008_v8, 4 }
 0x312   : > { %v2820_v36 = vadd.f32 %v2819_v59, %v2818_v58 }
 0x313   : > { %v3010_v53 = vadd.f32 %v3009_v18, %v3008_v8 }
 0x314   : > { %v2821_v38 = vrot.slane %v2820_v36, 1 }
 0x315   : > { %v3011_v44 = vrot.slane %v3010_v53, 2 }
 0x316   : > { %v2912_v33 = vpop.xlane.xlu0 %2911  ;;  %v2822_v40 = vadd.f32 %v2821_v38, %v2820_v36 }
 0x317   : > { %v2913_v16 = vrot.slane %v2912_v33, 4  ;;  %v3012_v20 = vadd.f32 %v3011_v44, %v3010_v53 }
 0x318   : > { %4447 = vpush %v2822_v40 }
 0x319   : > { %v2914_v17 = vadd.f32 %v2913_v16, %v2912_v33  ;;  %4449 = vpush %v2870_v26  ;;  %v3013_v7 = vrot.slane %v3012_v20, 1  ;;  %v2778_v33 = vlaneseq  ;;  %v2777_v26 = vld [vmem:[%s5945_s7] sm:$0x1] }
 0x31b   : > { %v2915_v57 = vrot.slane %v2914_v17, 2  ;;  %v3014_v63 = vadd.f32 %v3013_v7, %v3012_v20  ;;  %v5911_v16 = vand.u32 127, %v2778_v33 }
 0x31d   : > { %v2916_v24 = vadd.f32 %v2915_v57, %v2914_v17  ;;  %v3104_v19 = vpop.xlane.xlu1 %3103  ;;  %vm2824_vm10 = vcmp.eq.s32.totalorder %v5911_v16, 0  ;;  %vm2872_vm11 = vcmp.eq.s32.totalorder %v5911_v16, 1  ;;  %vm2920_vm12 = vcmp.eq.s32.totalorder %v5911_v16, 2 }
 0x31e   : > { %v3105_v28 = vrot.slane %v3104_v19, 4  ;;  %vm2968_vm13 = vcmp.eq.s32.totalorder %v5911_v16, 3  ;;  %vm3016_vm14 = vcmp.eq.s32.totalorder %v5911_v16, 4  ;;  %vm3064_vm15 = vcmp.eq.s32.totalorder %v5911_v16, 5 }
 0x31f   : > { %v2917_v23 = vrot.slane %v2916_v24, 1  ;;  %vm3112_vm0 = vcmp.eq.s32.totalorder %v5911_v16, 6  ;;  %vm3160_vm1 = vcmp.eq.s32.totalorder %v5911_v16, 7  ;;  %vm3208_vm2 = vcmp.eq.s32.totalorder %v5911_v16, 8 }
 0x320   : > { %v3106_v43 = vadd.f32 %v3105_v28, %v3104_v19  ;;  %vm3256_vm3 = vcmp.eq.s32.totalorder %v5911_v16, 9  ;;  %vm3304_vm4 = vcmp.eq.s32.totalorder %v5911_v16, 10 }
 0x321   : > { %v2918_v15 = vadd.f32 %v2917_v23, %v2916_v24 }
 0x322   : > { %v3107_v46 = vrot.slane %v3106_v43, 2 }
 0x323   : > { %4451 = vpush %v2918_v15 }
 0x324   : > { %v2960_v21 = vpop.xlane.xlu0 %2959  ;;  %v3108_v3 = vadd.f32 %v3107_v46, %v3106_v43 }
 0x325   : > { %v2961_v9 = vrot.slane %v2960_v21, 4 }
 0x326   : > { %v3109_v31 = vrot.slane %v3108_v3, 1 }
 0x327   : > { %v2962_v14 = vadd.f32 %v2961_v9, %v2960_v21 }
 0x328   : > { %v3110_v50 = vadd.f32 %v3109_v31, %v3108_v3 }
 0x329   : > { %v2963_v22 = vrot.slane %v2962_v14, 2 }
 0x32b   : > { %v2964_v27 = vadd.f32 %v2963_v22, %v2962_v14  ;;  %v3200_v56 = vpop.xlane.xlu1 %3199 }
 0x32c   : > { %v3201_v6 = vrot.slane %v3200_v56, 4 }
 0x32d   : > { %v2965_v60 = vrot.slane %v2964_v27, 1 }
 0x32e   : > { %v3202_v35 = vadd.f32 %v3201_v6, %v3200_v56 }
 0x32f   : > { %v2966_v12 = vadd.f32 %v2965_v60, %v2964_v27 }
 0x330   : > { %v3203_v0 = vrot.slane %v3202_v35, 2 }
 0x331   : > { %4453 = vpush %v2966_v12 }
 0x332   : > { %v3056_v30 = vpop.xlane.xlu0 %3055  ;;  %4455 = vpush %v3014_v63  ;;  %v3204_v39 = vadd.f32 %v3203_v0, %v3202_v35 }
 0x333   : > { %v3057_v1 = vrot.slane %v3056_v30, 4 }
 0x334   : > { %v3205_v29 = vrot.slane %v3204_v39, 1 }
 0x335   : > { %v3058_v61 = vadd.f32 %v3057_v1, %v3056_v30 }
 0x336   : > { %v3206_v59 = vadd.f32 %v3205_v29, %v3204_v39 }
 0x337   : > { %v3059_v13 = vrot.slane %v3058_v61, 2 }
 0x338   : > { %v3296_v5 = vpop.xlane.xlu1 %3295 }
 0x339   : > { %v3297_v42 = vrot.slane %v3296_v5, 4  ;;  %v3060_v25 = vadd.f32 %v3059_v13, %v3058_v61 }
 0x33b   : > { %v3061_v55 = vrot.slane %v3060_v25, 1  ;;  %v3298_v62 = vadd.f32 %v3297_v42, %v3296_v5 }
 0x33d   : > { %v3152_v47 = vpop.xlane.xlu0 %3151  ;;  %v3062_v4 = vadd.f32 %v3061_v55, %v3060_v25  ;;  %v3299_v11 = vrot.slane %v3298_v62, 2 }
 0x33e   : > { %v3153_v49 = vrot.slane %v3152_v47, 4 }
 0x33f   : > { %4457 = vpush %v3062_v4  ;;  %v3300_v34 = vadd.f32 %v3299_v11, %v3298_v62 }
 0x340   : > { %v3154_v48 = vadd.f32 %v3153_v49, %v3152_v47  ;;  %4459 = vpush %v3110_v50 }
 0x341   : > { %v3301_v51 = vrot.slane %v3300_v34, 1 }
 0x342   : > { %v3155_v52 = vrot.slane %v3154_v48, 2 }
 0x343   : > { %v3248_v45 = vpop.xlane.xlu0 %3247  ;;  %v3302_v38 = vadd.f32 %v3301_v51, %v3300_v34 }
 0x344   : > { %v3249_v2 = vrot.slane %v3248_v45, 4  ;;  %v3156_v10 = vadd.f32 %v3155_v52, %v3154_v48 }
 0x346   : > { %v3250_v54 = vadd.f32 %v3249_v2, %v3248_v45  ;;  %v3157_v41 = vrot.slane %v3156_v10, 1 }
 0x348   : > { %v3251_v32 = vrot.slane %v3250_v54, 2  ;;  %v3158_v37 = vadd.f32 %v3157_v41, %v3156_v10 }
 0x349   : > { %s4448_s13 = spop %4447 }
 0x34a   : > { %v3252_v58 = vadd.f32 %v3251_v32, %v3250_v54  ;;  %4461 = vpush %v3158_v37  ;;  %v2825_v18 = vstv %s4448_s13  ;;  %s4450_s14 = spop %4449 }
 0x34b   : > { %4463 = vpush %v3206_v59  ;;  %v2826_v40 = vadd.f32 %v2825_v18, %v2777_v26  ;;  %v2873_v57 = vstv %s4450_s14 }
 0x34c   : > { %v3253_v36 = vrot.slane %v3252_v58, 1 }
 0x34d   : > { %v2827_v17 = vsel %vm2824_vm10, %v2826_v40, %v2777_v26 }
 0x34e   : > { %v3254_v8 = vadd.f32 %v3253_v36, %v3252_v58  ;;  %v2874_v53 = vadd.f32 %v2873_v57, %v2827_v17 }
 0x350   : > { %4465 = vpush %v3254_v8  ;;  %v2875_v24 = vsel %vm2872_vm11, %v2874_v53, %v2827_v17 }
 0x351   : > { %4467 = vpush %v3302_v38 }
 0x354   : > { %s4452_s15 = spop %4451 }
 0x355   : > { %v2921_v19 = vstv %s4452_s15 }
 0x356   : > { %v2922_v23 = vadd.f32 %v2921_v19, %v2875_v24 }
 0x358   : > { %v2923_v44 = vsel %vm2920_vm12, %v2922_v23, %v2875_v24 }
 0x362   : > { %s4454_s20 = spop %4453 }
 0x363   : > { %v2969_v21 = vstv %s4454_s20  ;;  %s4456_s16 = spop %4455 }
 0x364   : > { %v2970_v9 = vadd.f32 %v2969_v21, %v2923_v44  ;;  %v3017_v28 = vstv %s4456_s16 }
 0x366   : > { %v2971_v15 = vsel %vm2968_vm13, %v2970_v9, %v2923_v44 }
 0x367   : > { %v3018_v14 = vadd.f32 %v3017_v28, %v2971_v15 }
 0x369   : > { %v3019_v20 = vsel %vm3016_vm14, %v3018_v14, %v2971_v15 }
 0x370   : > { %s4458_s17 = spop %4457 }
 0x371   : > { %v3065_v22 = vstv %s4458_s17  ;;  %s4460_s18 = spop %4459 }
 0x372   : > { %v3066_v43 = vadd.f32 %v3065_v22, %v3019_v20  ;;  %v3113_v7 = vstv %s4460_s18 }
 0x374   : > { %v3067_v27 = vsel %vm3064_vm15, %v3066_v43, %v3019_v20 }
 0x375   : > { %v3114_v56 = vadd.f32 %v3113_v7, %v3067_v27 }
 0x377   : > { %v3115_v60 = vsel %vm3112_vm0, %v3114_v56, %v3067_v27 }
 0x37b   : > { %s4462_s19 = spop %4461 }
 0x37c   : > { %v3161_v46 = vstv %s4462_s19  ;;  %s4464_s21 = spop %4463 }
 0x37d   : > { %v3162_v30 = vadd.f32 %v3161_v46, %v3115_v60  ;;  %v3209_v12 = vstv %s4464_s21 }
 0x37f   : > { %v3163_v1 = vsel %vm3160_vm1, %v3162_v30, %v3115_v60 }
 0x380   : > { %v3210_v6 = vadd.f32 %v3209_v12, %v3163_v1 }
 0x381   : > { %s4466_s22 = spop %4465 }
 0x382   : > { %v3211_v63 = vsel %vm3208_vm2, %v3210_v6, %v3163_v1  ;;  %v3257_v61 = vstv %s4466_s22  ;;  %s4468_s23 = spop %4467 }
 0x383   : > { %v3258_v3 = vadd.f32 %v3257_v61, %v3211_v63  ;;  %v3305_v5 = vstv %s4468_s23 }
 0x385   : > { %v3259_v13 = vsel %vm3256_vm3, %v3258_v3, %v3211_v63 }
 0x386   : > { %v3306_v35 = vadd.f32 %v3305_v5, %v3259_v13 }
 0x388   : > { %v3307_v42 = vsel %vm3304_vm4, %v3306_v35, %v3259_v13 }
 0x389   : > { %v3308_v25 = vsub.f32 0.0, %v3307_v42 }
 0x38b   : > { %v3309_v31 = vmul.f32 1.442695, %v3308_v25 }
 0x38d   : > { %4561 = vpow2.f32 %v3309_v31 }
 0x397   : > { %v4562_v55 = vpop.eup %4561 }
 0x398   : > { %v3311_v0 = vadd.f32 1.0, %v4562_v55 }
 0x39a   : > { %4563 = vrcp.f32 %v3311_v0 }
 0x3a4   : > { %v4564_v47 = vpop.eup %4563 }
 0x3a5   : > { %v3314_v62 = vsel %vm2824_vm10, %v4564_v47, %v3307_v42 }
 0x3a6   : > { %3316 = vst.msk [vmem:[%s336_s26] sm:$0x1] %vm3315_vm5, %v3314_v62 }
 0x3a7 PF: > { %s20_s30 = sadd.s32 1, %s4571_s30  }
 0x3a8   : > { %p17_p4 = scmp.ge.s32.totalorder %s20_s30, 4  }
 0x3aa   :  { %19 = sbr.rel (!%p17_p4) target bundleno = 1 (0x1), region = 119 }

</bundles_post_ra>
